<compile_context>
chip_gen: v5e
topology: v5e:2x2
jax: 0.10.0
libtpu: 0.0.40
codegen_flags: <defaults>
</compile_context>

<pallas_src>
import functools

import jax
import jax.numpy as jnp
from jax.experimental import pallas as pl
from jax.experimental.pallas import tpu as pltpu

LANE = 128


def _block_kernel(x_ref, xh_ref, w1_ref, b1_ref, w2_ref, b2_ref, w3_ref,
                  b3_ref, o_ref, pad_ref, *, TH, W, Wrowp, Wp, d, n_tiles):
    """One (batch, H-tile) step of the bottleneck.

    x_ref   : (1, TH*W, Cp)     f32  main rows of this H-tile (flattened)
    xh_ref  : (1, 1, 2*d*W, Cp) f32  d halo rows above + d halo rows below
    w1_ref  : (Cp, Wp)          bf16 conv1 (BN1 scale folded)
    w2_ref  : (T, 9*128, 128)   bf16 conv2 per-lane-tile, per-tap weight
    w3_ref  : (Wp, Cop)         bf16 conv3 (BN3 scale folded)
    b*_ref  : (1, .)            f32  folded BN biases
    pad_ref : (TH+2d, Wrowp, Wp) f32 scratch: zero-padded conv2 input rows
    """
    ht = pl.program_id(1)
    n_ht = pl.num_programs(1)

    # ---- conv1 (1x1) + bias + relu, on the main rows and on the halo rows ---
    h1 = jnp.dot(x_ref[0].astype(jnp.bfloat16), w1_ref[...],
                 preferred_element_type=jnp.float32)
    h1 = jnp.maximum(h1 + b1_ref[...], 0.0)                     # (TH*W, Wp)

    h1h = jnp.dot(xh_ref[0, 0].astype(jnp.bfloat16), w1_ref[...],
                  preferred_element_type=jnp.float32)
    h1h = jnp.maximum(h1h + b1_ref[...], 0.0)                    # (2*d*W, Wp)

    # Rows outside the image must be ZERO in the conv2 input (the module zero
    # pads AFTER conv1/bn1/relu), so mask the halo rows at the image edges.
    top = jnp.where(ht == 0, 0.0, h1h[:d * W])                   # (d*W, Wp)
    bot = jnp.where(ht == n_ht - 1, 0.0, h1h[d * W:])            # (d*W, Wp)

    # ---- stage conv2 input into the padded scratch ---------------------------
    # One full-row-width unmasked store per strip; the left/right column-halo
    # zeros are folded into the store (no thin masked stores per step).  The
    # whole scratch is rewritten every step, so it is safe under "parallel"
    # (megacore) scheduling of both grid axes.
    rpad = Wrowp - W - d

    def _padded_rows(rows2d, nrows):
        r = rows2d.reshape(nrows, W, Wp)
        return jnp.concatenate(
            [jnp.zeros((nrows, d, Wp), jnp.float32), r,
             jnp.zeros((nrows, rpad, Wp), jnp.float32)], axis=1)

    pad_ref[:d, :, :] = _padded_rows(top, d)
    pad_ref[d:d + TH, :, :] = _padded_rows(h1, TH)
    pad_ref[d + TH:, :, :] = _padded_rows(bot, d)

    # ---- conv2: grouped 3x3 (stride 1, padding=d, dilation=d) ---------------
    # Per 128-lane tile of the width: accumulate three K=3*128 dots (one per
    # kernel row, the three kw taps stacked in K) into an f32 accumulator.
    # The weight is block-diagonal only WITHIN a lane tile, so no cross-tile
    # zero FLOPs are spent.  The kw-shifted column reads are sublane-unaligned
    # by construction (offset d); accepted as an XLU relayout cost.
    accs = [jnp.zeros((TH * W, LANE), jnp.float32) for _ in range(n_tiles)]
    for kh in range(3):
        rows = pad_ref[kh * d:kh * d + TH, :, :]                  # (TH,Wrowp,Wp)
        cols = [rows[:, kw * d:kw * d + W, :]
                .reshape(TH * W, Wp).astype(jnp.bfloat16) for kw in range(3)]
        for t in range(n_tiles):
            cat = jnp.concatenate(
                [c[:, t * LANE:(t + 1) * LANE] for c in cols], axis=-1)
            accs[t] += jnp.dot(
                cat, w2_ref[t, kh * 3 * LANE:(kh + 1) * 3 * LANE, :],
                preferred_element_type=jnp.float32)

    h2_tiles = [
        jnp.maximum(accs[t] + b2_ref[:, t * LANE:(t + 1) * LANE], 0.0)
        .astype(jnp.bfloat16) for t in range(n_tiles)]
    h2 = h2_tiles[0] if n_tiles == 1 else jnp.concatenate(h2_tiles, axis=-1)

    # ---- conv3 (1x1) + bias + identity residual + relu ----------------------
    h3 = jnp.dot(h2, w3_ref[...], preferred_element_type=jnp.float32)
    # Re-read x for the residual (fresh VMEM load, narrow live range).
    o_ref[0] = jnp.maximum(h3 + b3_ref[...] + x_ref[0], 0.0).astype(o_ref.dtype)


def grouped_conv_block(x_nhwc, w1, b1, w2_tiles, b2, w3, b3, *, dilation=1,
                       tile_h=None):
    """GroupedConvBlock forward.

    x_nhwc  : (N, H, W, Cp) f32, channels zero-padded to a multiple of 128.
    w1      : (Cp, Wp)  bf16, BN1 scale folded into output channels.
    w2_tiles: (Wp//128, 9*128, 128) bf16, per-lane-tile per-tap grouped 3x3
              weight (within-tile block-diagonal), BN2 scale folded.
    w3      : (Wp, Cop) bf16, BN3 scale folded.
    b1/b2/b3: (1, Wp)/(1, Wp)/(1, Cop) f32 folded BN biases.
    """
    N, H, W, Cp = x_nhwc.shape
    Wp = w1.shape[1]
    Cop = w3.shape[1]
    d = dilation
    assert d >= 1, "dilation must be >= 1"
    assert W % 8 == 0, "W must be sublane aligned for free reshapes"
    assert Cp % LANE == 0 and Wp % LANE == 0 and Cop % LANE == 0
    assert Cp == Cop, "identity residual requires inplanes == planes*expansion"
    n_tiles = Wp // LANE
    assert w2_tiles.shape == (n_tiles, 9 * LANE, LANE)

    TH = H if tile_h is None else tile_h
    assert H % TH == 0, "tile_h must divide H"
    n_ht = H // TH
    Wrowp = ((W + 2 * d + 7) // 8) * 8

    # Per-tile halo rows (d above + d below, zeros at the image border),
    # gathered once here so every kernel input is a plain, non-overlapping
    # BlockSpec block (no overlapping-window index maps, no manual DMA).
    zeros_halo = jnp.zeros((N, d, W, Cp), x_nhwc.dtype)
    halos = []
    for t in range(n_ht):
        top = x_nhwc[:, t * TH - d:t * TH] if t > 0 else zeros_halo
        bot = (x_nhwc[:, (t + 1) * TH:(t + 1) * TH + d]
               if t < n_ht - 1 else zeros_halo)
        halos.append(jnp.concatenate([top, bot], axis=1))
    x_halo = jnp.stack(halos, axis=1).reshape(N, n_ht, 2 * d * W, Cp)

    x_flat = x_nhwc.reshape(N, H * W, Cp)

    kernel = functools.partial(_block_kernel, TH=TH, W=W, Wrowp=Wrowp, Wp=Wp,
                               d=d, n_tiles=n_tiles)

    # Weights/biases: constant index map -> single-buffered (no wasted VMEM).
    wspec = lambda shape: pl.BlockSpec(shape, lambda n, h: (0,) * len(shape),
                                       pipeline_mode=pl.Buffered(1))

    grid_spec = pltpu.PrefetchScalarGridSpec(
        num_scalar_prefetch=0,
        grid=(N, n_ht),
        in_specs=[
            pl.BlockSpec((1, TH * W, Cp), lambda n, h: (n, h, 0)),        # x
            pl.BlockSpec((1, 1, 2 * d * W, Cp), lambda n, h: (n, h, 0, 0)),
            wspec((Cp, Wp)),                                              # w1
            wspec((1, Wp)),                                               # b1
            wspec((n_tiles, 9 * LANE, LANE)),                             # w2
            wspec((1, Wp)),                                               # b2
            wspec((Wp, Cop)),                                             # w3
            wspec((1, Cop)),                                              # b3
        ],
        out_specs=pl.BlockSpec((1, TH * W, Cop), lambda n, h: (n, h, 0)),
        scratch_shapes=[
            pltpu.VMEM((TH + 2 * d, Wrowp, Wp), jnp.float32),
        ],
    )

    out_flat = pl.pallas_call(
        kernel,
        out_shape=jax.ShapeDtypeStruct((N, H * W, Cop), jnp.float32),
        grid_spec=grid_spec,
        compiler_params=pltpu.CompilerParams(
            dimension_semantics=("parallel", "parallel"),
            # Spatial tiling keeps blocks small; 48 MiB is safe on v5e/v6e/v7x.
            vmem_limit_bytes=48 * 1024 * 1024),
    )(x_flat, x_halo, w1, b1, w2_tiles, b2, w3, b3)
    return out_flat.reshape(N, H, W, Cop)


# ----------------------------- helpers / refs -------------------------------

def _fold_bn(gamma, beta, mean, var, eps=1e-5):
    scale = gamma / jnp.sqrt(var + eps)
    bias = beta - mean * scale
    return scale, bias


def _round_up(x, m):
    return (x + m - 1) // m * m


def _reference_mirrored(x_nhwc, w1f, b1, w2f_hwio, b2, w3f, b3, *, groups,
                        dilation):
    """lax/XLA reference mirroring the kernel numerics (bf16 MXU operands,
    f32 accumulation and epilogue, BN scale folded into the weights)."""
    f32 = jnp.float32
    h = jnp.einsum('nhwc,cd->nhwd', x_nhwc.astype(jnp.bfloat16), w1f,
                   preferred_element_type=f32)
    h = jax.nn.relu(h + b1)
    h = jax.lax.conv_general_dilated(
        h.astype(jnp.bfloat16), w2f_hwio, window_strides=(1, 1),
        padding=[(dilation, dilation), (dilation, dilation)],
        rhs_dilation=(dilation, dilation),
        dimension_numbers=('NHWC', 'HWIO', 'NHWC'),
        feature_group_count=groups, preferred_element_type=f32)
    h = jax.nn.relu(h + b2)
    h = jnp.einsum('nhwc,cd->nhwd', h.astype(jnp.bfloat16), w3f,
                   preferred_element_type=f32)
    return jax.nn.relu(h + b3 + x_nhwc)


def _reference_f32(x_nhwc, w1, s1, b1, w2g, s2, b2, w3, s3, b3, *, groups,
                   dilation):
    """Pure f32, unfused-BN reference (the PyTorch module semantics)."""
    h = jnp.einsum('nhwc,cd->nhwd', x_nhwc, w1)
    h = jax.nn.relu(h * s1 + b1)
    w_hwio = jnp.concatenate([w2g[g] for g in range(groups)], axis=-1)
    h = jax.lax.conv_general_dilated(
        h, w_hwio, window_strides=(1, 1),
        padding=[(dilation, dilation), (dilation, dilation)],
        rhs_dilation=(dilation, dilation),
        dimension_numbers=('NHWC', 'HWIO', 'NHWC'),
        feature_group_count=groups)
    h = jax.nn.relu(h * s2 + b2)
    h = jnp.einsum('nhwc,cd->nhwd', h, w3)
    h = h * s3 + b3
    return jax.nn.relu(h + x_nhwc)


# --------------------------------- demo --------------------------------------

if __name__ == "__main__":
    # GroupedConvBlock(inplanes=16, planes=4, stride=1, groups=2, base_width=64)
    inplanes, planes, groups, base_width, dilation = 16, 4, 2, 64, 1
    width = int(planes * (base_width / 64.0)) * groups        # 8
    cout = planes * 4                                          # expansion=4 -> 16
    cg = width // groups
    N, H, W = 2, 16, 16
    TILE_H = 8                                                 # 2 spatial tiles

    Cp = _round_up(inplanes, LANE)     # 128
    Wp = _round_up(width, LANE)        # 128
    Cop = _round_up(cout, LANE)        # 128
    T = Wp // LANE

    key = jax.random.PRNGKey(0)
    ks = jax.random.split(key, 8)

    # input (PyTorch NCHW) -> NHWC
    x_nchw = jax.random.normal(ks[0], (N, inplanes, H, W), jnp.float32)
    x_nhwc = jnp.transpose(x_nchw, (0, 2, 3, 1))

    # conv weights (bias=False) in matmul form; grouped 3x3 per-group (kh,kw,ci,co)
    w1 = jax.random.normal(ks[1], (inplanes, width), jnp.float32) * 0.1
    w2g = jax.random.normal(ks[2], (groups, 3, 3, cg, cg), jnp.float32) * 0.1
    w3 = jax.random.normal(ks[3], (width, cout), jnp.float32) * 0.1

    # BatchNorm params (eval mode)
    def bn_params(k, c):
        k1, k2, k3, k4 = jax.random.split(k, 4)
        gamma = 1.0 + 0.2 * jax.random.normal(k1, (c,), jnp.float32)
        beta = 0.1 * jax.random.normal(k2, (c,), jnp.float32)
        mean = 0.1 * jax.random.normal(k3, (c,), jnp.float32)
        var = jnp.abs(jax.random.normal(k4, (c,), jnp.float32)) + 0.5
        return _fold_bn(gamma, beta, mean, var)

    s1, b1 = bn_params(ks[4], width)
    s2, b2 = bn_params(ks[5], width)
    s3, b3 = bn_params(ks[6], cout)

    # ---- one-time parameter prep (off the critical path) ----
    w1f = (w1 * s1[None, :]).astype(jnp.bfloat16)
    w3f = (w3 * s3[None, :]).astype(jnp.bfloat16)
    w2gf = (w2g * s2.reshape(groups, 1, 1, 1, cg)).astype(jnp.bfloat16)

    # conv2 weight in per-lane-tile / per-tap form.  Each group's channels live
    # inside a single 128-lane tile, so output tile t only contracts against
    # input tile t (no cross-tile zeros on the MXU).
    w2_tiles = jnp.zeros((T, 9 * LANE, LANE), jnp.bfloat16)
    for g in range(groups):
        t = (g * cg) // LANE
        o = (g * cg) % LANE
        assert o + cg <= LANE, "a group must not straddle a 128-lane tile"
        for kh in range(3):
            for kw in range(3):
                k = kh * 3 + kw
                w2_tiles = w2_tiles.at[
                    t, k * LANE + o:k * LANE + o + cg, o:o + cg
                ].set(w2gf[g, kh, kw])

    # channel-pad 1x1 weights and biases to the 128-lane width
    w1p = jnp.pad(w1f, ((0, Cp - inplanes), (0, Wp - width)))
    w3p = jnp.pad(w3f, ((0, Wp - width), (0, Cop - cout)))
    b1p = jnp.pad(b1, (0, Wp - width)).reshape(1, Wp)
    b2p = jnp.pad(b2, (0, Wp - width)).reshape(1, Wp)
    b3p = jnp.pad(b3, (0, Cop - cout)).reshape(1, Cop)

    # lane-dense activation layout: channels zero-padded to 128
    x_pad = jnp.pad(x_nhwc, ((0, 0), (0, 0), (0, 0), (0, Cp - inplanes)))

    out_full = grouped_conv_block(x_pad, w1p, b1p, w2_tiles, b2p, w3p, b3p,
                                  dilation=dilation, tile_h=TILE_H)
    out_full = jax.block_until_ready(out_full)
    out = out_full[..., :cout]

    # reference 1: same numerics (bf16 operands / folded BN), independent impl
    w2f_hwio = jnp.concatenate([w2gf[g] for g in range(groups)], axis=-1)
    ref_bf16 = _reference_mirrored(x_nhwc, w1f, b1, w2f_hwio, b2, w3f, b3,
                                   groups=groups, dilation=dilation)
    # reference 2: plain f32, unfused BN (module semantics), looser tolerance
    ref_f32 = _reference_f32(x_nhwc, w1, s1, b1, w2g, s2, b2, w3, s3, b3,
                             groups=groups, dilation=dilation)

    assert out.shape == (N, H, W, cout)
    err1 = float(jnp.max(jnp.abs(out - ref_bf16)))
    err2 = float(jnp.max(jnp.abs(out - ref_f32)))
    assert jnp.allclose(out, ref_bf16, rtol=1e-3, atol=1e-3), err1
    assert jnp.allclose(out, ref_f32, rtol=2e-2, atol=2e-2), err2

    print("KERNEL_OK")
</pallas_src>

<mosaic_0001>
module attributes {stable_mosaic.version = 11 : i64} {
  func.func @_block_kernel(%arg0: i32, %arg1: i32, %arg2: memref<1x128x128xf32, #tpu.memory_space<vmem>>, %arg3: memref<1x1x32x128xf32, #tpu.memory_space<vmem>>, %arg4: memref<128x128xbf16, #tpu.memory_space<vmem>>, %arg5: memref<1x128xf32, #tpu.memory_space<vmem>>, %arg6: memref<1x1152x128xbf16, #tpu.memory_space<vmem>>, %arg7: memref<1x128xf32, #tpu.memory_space<vmem>>, %arg8: memref<128x128xbf16, #tpu.memory_space<vmem>>, %arg9: memref<1x128xf32, #tpu.memory_space<vmem>>, %arg10: memref<1x128x128xf32, #tpu.memory_space<vmem>>, %arg11: memref<10x24x128xf32, #tpu.memory_space<vmem>>) attributes {dimension_semantics = [#tpu.dimension_semantics<parallel>, #tpu.dimension_semantics<parallel>], iteration_bounds = array<i64: 2, 2>, scalar_prefetch = 0 : i64, scratch_operands = 1 : i64, tpu.core_type = #tpu.core_type<tc>, window_params = [{transform_indices = @transform_0, window_bounds = array<i64: 1, 128, 128>}, {transform_indices = @transform_1, window_bounds = array<i64: 1, 1, 32, 128>}, {pipeline_mode = #tpu.pipeline_mode<synchronous>, transform_indices = @transform_2, window_bounds = array<i64: 128, 128>}, {pipeline_mode = #tpu.pipeline_mode<synchronous>, transform_indices = @transform_3, window_bounds = array<i64: 1, 128>}, {pipeline_mode = #tpu.pipeline_mode<synchronous>, transform_indices = @transform_4, window_bounds = array<i64: 1, 1152, 128>}, {pipeline_mode = #tpu.pipeline_mode<synchronous>, transform_indices = @transform_5, window_bounds = array<i64: 1, 128>}, {pipeline_mode = #tpu.pipeline_mode<synchronous>, transform_indices = @transform_6, window_bounds = array<i64: 128, 128>}, {pipeline_mode = #tpu.pipeline_mode<synchronous>, transform_indices = @transform_7, window_bounds = array<i64: 1, 128>}, {transform_indices = @transform_8, window_bounds = array<i64: 1, 128, 128>}]} {
    %c0 = arith.constant 0 : index
    %c0_0 = arith.constant 0 : index
    %c0_1 = arith.constant 0 : index
    %0 = vector.load %arg2[%c0, %c0_0, %c0_1] : memref<1x128x128xf32, #tpu.memory_space<vmem>>, vector<1x128x128xf32>
    %1 = vector.shape_cast %0 : vector<1x128x128xf32> to vector<128x128xf32>
    %2 = arith.truncf %1 : vector<128x128xf32> to vector<128x128xbf16>
    %c0_2 = arith.constant 0 : index
    %c0_3 = arith.constant 0 : index
    %3 = vector.load %arg4[%c0_2, %c0_3] : memref<128x128xbf16, #tpu.memory_space<vmem>>, vector<128x128xbf16>
    %cst = arith.constant dense<0.000000e+00> : vector<128x128xf32>
    %4 = tpu.matmul %2, %3, %cst {dimension_numbers = #tpu.dot_dimension_numbers<[1], [0], [0], [1], [0, 0, 1, 1], [], []>} : vector<128x128xbf16>, vector<128x128xbf16>, vector<128x128xf32> -> vector<128x128xf32>
    %c0_4 = arith.constant 0 : index
    %c0_5 = arith.constant 0 : index
    %5 = vector.load %arg5[%c0_4, %c0_5] : memref<1x128xf32, #tpu.memory_space<vmem>>, vector<1x128xf32>
    %6 = vector.broadcast %5 : vector<1x128xf32> to vector<128x128xf32>
    %7 = arith.addf %4, %6 : vector<128x128xf32>
    %cst_6 = arith.constant 0.000000e+00 : f32
    %8 = vector.broadcast %cst_6 : f32 to vector<128x128xf32>
    %9 = arith.maximumf %7, %8 : vector<128x128xf32>
    %c0_7 = arith.constant 0 : index
    %c0_8 = arith.constant 0 : index
    %c0_9 = arith.constant 0 : index
    %c0_10 = arith.constant 0 : index
    %10 = vector.load %arg3[%c0_7, %c0_8, %c0_9, %c0_10] : memref<1x1x32x128xf32, #tpu.memory_space<vmem>>, vector<1x1x32x128xf32>
    %11 = vector.shape_cast %10 : vector<1x1x32x128xf32> to vector<32x128xf32>
    %12 = arith.truncf %11 : vector<32x128xf32> to vector<32x128xbf16>
    %c0_11 = arith.constant 0 : index
    %c0_12 = arith.constant 0 : index
    %13 = vector.load %arg4[%c0_11, %c0_12] : memref<128x128xbf16, #tpu.memory_space<vmem>>, vector<128x128xbf16>
    %cst_13 = arith.constant dense<0.000000e+00> : vector<32x128xf32>
    %14 = tpu.matmul %12, %13, %cst_13 {dimension_numbers = #tpu.dot_dimension_numbers<[1], [0], [0], [1], [0, 0, 1, 1], [], []>} : vector<32x128xbf16>, vector<128x128xbf16>, vector<32x128xf32> -> vector<32x128xf32>
    %c0_14 = arith.constant 0 : index
    %c0_15 = arith.constant 0 : index
    %15 = vector.load %arg5[%c0_14, %c0_15] : memref<1x128xf32, #tpu.memory_space<vmem>>, vector<1x128xf32>
    %16 = vector.broadcast %15 : vector<1x128xf32> to vector<32x128xf32>
    %17 = arith.addf %14, %16 : vector<32x128xf32>
    %cst_16 = arith.constant 0.000000e+00 : f32
    %18 = vector.broadcast %cst_16 : f32 to vector<32x128xf32>
    %19 = arith.maximumf %17, %18 : vector<32x128xf32>
    %c0_i32 = arith.constant 0 : i32
    %20 = arith.cmpi eq, %arg1, %c0_i32 : i32
    %21 = vector.extract_strided_slice %19 {offsets = [0, 0], sizes = [16, 128], strides = [1, 1]} : vector<32x128xf32> to vector<16x128xf32>
    %cst_17 = arith.constant 0.000000e+00 : f32
    %22 = vector.broadcast %cst_17 : f32 to vector<16x128xf32>
    %23 = arith.select %20, %22, %21 : vector<16x128xf32>
    %c1_i32 = arith.constant 1 : i32
    %24 = arith.cmpi eq, %arg1, %c1_i32 : i32
    %25 = vector.extract_strided_slice %19 {offsets = [16, 0], sizes = [16, 128], strides = [1, 1]} : vector<32x128xf32> to vector<16x128xf32>
    %cst_18 = arith.constant 0.000000e+00 : f32
    %26 = vector.broadcast %cst_18 : f32 to vector<16x128xf32>
    %27 = arith.select %24, %26, %25 : vector<16x128xf32>
    %28 = vector.shape_cast %23 : vector<16x128xf32> to vector<1x16x128xf32>
    %cst_19 = arith.constant 0.000000e+00 : f32
    %29 = vector.broadcast %cst_19 : f32 to vector<1x1x128xf32>
    %cst_20 = arith.constant 0.000000e+00 : f32
    %30 = vector.broadcast %cst_20 : f32 to vector<1x7x128xf32>
    %31 = tpu.concatenate %29, %28, %30 in 1 : vector<1x1x128xf32>, vector<1x16x128xf32>, vector<1x7x128xf32> -> vector<1x24x128xf32>
    %c0_21 = arith.constant 0 : index
    %c0_22 = arith.constant 0 : index
    %c0_23 = arith.constant 0 : index
    %32 = vector.load %arg11[%c0_21, %c0_22, %c0_23] : memref<10x24x128xf32, #tpu.memory_space<vmem>>, vector<1x24x128xf32>
    tpu.vector_store %arg11[%c0_21, %c0_22, %c0_23], %31 {strides = array<i32>} : memref<10x24x128xf32, #tpu.memory_space<vmem>>, vector<1x24x128xf32>,
    %33 = vector.shape_cast %9 : vector<128x128xf32> to vector<8x16x128xf32>
    %cst_24 = arith.constant 0.000000e+00 : f32
    %34 = vector.broadcast %cst_24 : f32 to vector<8x1x128xf32>
    %cst_25 = arith.constant 0.000000e+00 : f32
    %35 = vector.broadcast %cst_25 : f32 to vector<8x7x128xf32>
    %36 = tpu.concatenate %34, %33, %35 in 1 : vector<8x1x128xf32>, vector<8x16x128xf32>, vector<8x7x128xf32> -> vector<8x24x128xf32>
    %c1 = arith.constant 1 : index
    %c0_26 = arith.constant 0 : index
    %c0_27 = arith.constant 0 : index
    %37 = vector.load %arg11[%c1, %c0_26, %c0_27] : memref<10x24x128xf32, #tpu.memory_space<vmem>>, vector<8x24x128xf32>
    tpu.vector_store %arg11[%c1, %c0_26, %c0_27], %36 {strides = array<i32>} : memref<10x24x128xf32, #tpu.memory_space<vmem>>, vector<8x24x128xf32>,
    %38 = vector.shape_cast %27 : vector<16x128xf32> to vector<1x16x128xf32>
    %cst_28 = arith.constant 0.000000e+00 : f32
    %39 = vector.broadcast %cst_28 : f32 to vector<1x1x128xf32>
    %cst_29 = arith.constant 0.000000e+00 : f32
    %40 = vector.broadcast %cst_29 : f32 to vector<1x7x128xf32>
    %41 = tpu.concatenate %39, %38, %40 in 1 : vector<1x1x128xf32>, vector<1x16x128xf32>, vector<1x7x128xf32> -> vector<1x24x128xf32>
    %c9 = arith.constant 9 : index
    %c0_30 = arith.constant 0 : index
    %c0_31 = arith.constant 0 : index
    %42 = vector.load %arg11[%c9, %c0_30, %c0_31] : memref<10x24x128xf32, #tpu.memory_space<vmem>>, vector<1x24x128xf32>
    tpu.vector_store %arg11[%c9, %c0_30, %c0_31], %41 {strides = array<i32>} : memref<10x24x128xf32, #tpu.memory_space<vmem>>, vector<1x24x128xf32>,
    %cst_32 = arith.constant 0.000000e+00 : f32
    %43 = vector.broadcast %cst_32 : f32 to vector<128x128xf32>
    %c0_33 = arith.constant 0 : index
    %c0_34 = arith.constant 0 : index
    %c0_35 = arith.constant 0 : index
    %44 = vector.load %arg11[%c0_33, %c0_34, %c0_35] : memref<10x24x128xf32, #tpu.memory_space<vmem>>, vector<8x24x128xf32>
    %45 = vector.extract_strided_slice %44 {offsets = [0, 0, 0], sizes = [8, 16, 128], strides = [1, 1, 1]} : vector<8x24x128xf32> to vector<8x16x128xf32>
    %46 = vector.shape_cast %45 : vector<8x16x128xf32> to vector<128x128xf32>
    %47 = arith.truncf %46 : vector<128x128xf32> to vector<128x128xbf16>
    %48 = vector.extract_strided_slice %44 {offsets = [0, 1, 0], sizes = [8, 16, 128], strides = [1, 1, 1]} : vector<8x24x128xf32> to vector<8x16x128xf32>
    %49 = vector.shape_cast %48 : vector<8x16x128xf32> to vector<128x128xf32>
    %50 = arith.truncf %49 : vector<128x128xf32> to vector<128x128xbf16>
    %51 = vector.extract_strided_slice %44 {offsets = [0, 2, 0], sizes = [8, 16, 128], strides = [1, 1, 1]} : vector<8x24x128xf32> to vector<8x16x128xf32>
    %52 = vector.shape_cast %51 : vector<8x16x128xf32> to vector<128x128xf32>
    %53 = arith.truncf %52 : vector<128x128xf32> to vector<128x128xbf16>
    %54 = tpu.concatenate %47, %50, %53 in 1 : vector<128x128xbf16>, vector<128x128xbf16>, vector<128x128xbf16> -> vector<128x384xbf16>
    %c0_36 = arith.constant 0 : index
    %c0_37 = arith.constant 0 : index
    %c0_38 = arith.constant 0 : index
    %55 = vector.load %arg6[%c0_36, %c0_37, %c0_38] : memref<1x1152x128xbf16, #tpu.memory_space<vmem>>, vector<1x384x128xbf16>
    %56 = vector.shape_cast %55 : vector<1x384x128xbf16> to vector<384x128xbf16>
    %cst_39 = arith.constant dense<0.000000e+00> : vector<128x128xf32>
    %57 = tpu.matmul %54, %56, %cst_39 {dimension_numbers = #tpu.dot_dimension_numbers<[1], [0], [0], [1], [0, 0, 1, 1], [], []>} : vector<128x384xbf16>, vector<384x128xbf16>, vector<128x128xf32> -> vector<128x128xf32>
    %58 = arith.addf %43, %57 : vector<128x128xf32>
    %c1_40 = arith.constant 1 : index
    %c0_41 = arith.constant 0 : index
    %c0_42 = arith.constant 0 : index
    %59 = vector.load %arg11[%c1_40, %c0_41, %c0_42] : memref<10x24x128xf32, #tpu.memory_space<vmem>>, vector<8x24x128xf32>
    %60 = vector.extract_strided_slice %59 {offsets = [0, 0, 0], sizes = [8, 16, 128], strides = [1, 1, 1]} : vector<8x24x128xf32> to vector<8x16x128xf32>
    %61 = vector.shape_cast %60 : vector<8x16x128xf32> to vector<128x128xf32>
    %62 = arith.truncf %61 : vector<128x128xf32> to vector<128x128xbf16>
    %63 = vector.extract_strided_slice %59 {offsets = [0, 1, 0], sizes = [8, 16, 128], strides = [1, 1, 1]} : vector<8x24x128xf32> to vector<8x16x128xf32>
    %64 = vector.shape_cast %63 : vector<8x16x128xf32> to vector<128x128xf32>
    %65 = arith.truncf %64 : vector<128x128xf32> to vector<128x128xbf16>
    %66 = vector.extract_strided_slice %59 {offsets = [0, 2, 0], sizes = [8, 16, 128], strides = [1, 1, 1]} : vector<8x24x128xf32> to vector<8x16x128xf32>
    %67 = vector.shape_cast %66 : vector<8x16x128xf32> to vector<128x128xf32>
    %68 = arith.truncf %67 : vector<128x128xf32> to vector<128x128xbf16>
    %69 = tpu.concatenate %62, %65, %68 in 1 : vector<128x128xbf16>, vector<128x128xbf16>, vector<128x128xbf16> -> vector<128x384xbf16>
    %c0_43 = arith.constant 0 : index
    %c384 = arith.constant 384 : index
    %c0_44 = arith.constant 0 : index
    %70 = vector.load %arg6[%c0_43, %c384, %c0_44] : memref<1x1152x128xbf16, #tpu.memory_space<vmem>>, vector<1x384x128xbf16>
    %71 = vector.shape_cast %70 : vector<1x384x128xbf16> to vector<384x128xbf16>
    %cst_45 = arith.constant dense<0.000000e+00> : vector<128x128xf32>
    %72 = tpu.matmul %69, %71, %cst_45 {dimension_numbers = #tpu.dot_dimension_numbers<[1], [0], [0], [1], [0, 0, 1, 1], [], []>} : vector<128x384xbf16>, vector<384x128xbf16>, vector<128x128xf32> -> vector<128x128xf32>
    %73 = arith.addf %58, %72 : vector<128x128xf32>
    %c2 = arith.constant 2 : index
    %c0_46 = arith.constant 0 : index
    %c0_47 = arith.constant 0 : index
    %74 = vector.load %arg11[%c2, %c0_46, %c0_47] : memref<10x24x128xf32, #tpu.memory_space<vmem>>, vector<8x24x128xf32>
    %75 = vector.extract_strided_slice %74 {offsets = [0, 0, 0], sizes = [8, 16, 128], strides = [1, 1, 1]} : vector<8x24x128xf32> to vector<8x16x128xf32>
    %76 = vector.shape_cast %75 : vector<8x16x128xf32> to vector<128x128xf32>
    %77 = arith.truncf %76 : vector<128x128xf32> to vector<128x128xbf16>
    %78 = vector.extract_strided_slice %74 {offsets = [0, 1, 0], sizes = [8, 16, 128], strides = [1, 1, 1]} : vector<8x24x128xf32> to vector<8x16x128xf32>
    %79 = vector.shape_cast %78 : vector<8x16x128xf32> to vector<128x128xf32>
    %80 = arith.truncf %79 : vector<128x128xf32> to vector<128x128xbf16>
    %81 = vector.extract_strided_slice %74 {offsets = [0, 2, 0], sizes = [8, 16, 128], strides = [1, 1, 1]} : vector<8x24x128xf32> to vector<8x16x128xf32>
    %82 = vector.shape_cast %81 : vector<8x16x128xf32> to vector<128x128xf32>
    %83 = arith.truncf %82 : vector<128x128xf32> to vector<128x128xbf16>
    %84 = tpu.concatenate %77, %80, %83 in 1 : vector<128x128xbf16>, vector<128x128xbf16>, vector<128x128xbf16> -> vector<128x384xbf16>
    %c0_48 = arith.constant 0 : index
    %c768 = arith.constant 768 : index
    %c0_49 = arith.constant 0 : index
    %85 = vector.load %arg6[%c0_48, %c768, %c0_49] : memref<1x1152x128xbf16, #tpu.memory_space<vmem>>, vector<1x384x128xbf16>
    %86 = vector.shape_cast %85 : vector<1x384x128xbf16> to vector<384x128xbf16>
    %cst_50 = arith.constant dense<0.000000e+00> : vector<128x128xf32>
    %87 = tpu.matmul %84, %86, %cst_50 {dimension_numbers = #tpu.dot_dimension_numbers<[1], [0], [0], [1], [0, 0, 1, 1], [], []>} : vector<128x384xbf16>, vector<384x128xbf16>, vector<128x128xf32> -> vector<128x128xf32>
    %88 = arith.addf %73, %87 : vector<128x128xf32>
    %c0_51 = arith.constant 0 : index
    %c0_52 = arith.constant 0 : index
    %89 = vector.load %arg7[%c0_51, %c0_52] : memref<1x128xf32, #tpu.memory_space<vmem>>, vector<1x128xf32>
    %90 = vector.broadcast %89 : vector<1x128xf32> to vector<128x128xf32>
    %91 = arith.addf %88, %90 : vector<128x128xf32>
    %cst_53 = arith.constant 0.000000e+00 : f32
    %92 = vector.broadcast %cst_53 : f32 to vector<128x128xf32>
    %93 = arith.maximumf %91, %92 : vector<128x128xf32>
    %94 = arith.truncf %93 : vector<128x128xf32> to vector<128x128xbf16>
    %c0_54 = arith.constant 0 : index
    %c0_55 = arith.constant 0 : index
    %95 = vector.load %arg8[%c0_54, %c0_55] : memref<128x128xbf16, #tpu.memory_space<vmem>>, vector<128x128xbf16>
    %cst_56 = arith.constant dense<0.000000e+00> : vector<128x128xf32>
    %96 = tpu.matmul %94, %95, %cst_56 {dimension_numbers = #tpu.dot_dimension_numbers<[1], [0], [0], [1], [0, 0, 1, 1], [], []>} : vector<128x128xbf16>, vector<128x128xbf16>, vector<128x128xf32> -> vector<128x128xf32>
    %c0_57 = arith.constant 0 : index
    %c0_58 = arith.constant 0 : index
    %97 = vector.load %arg9[%c0_57, %c0_58] : memref<1x128xf32, #tpu.memory_space<vmem>>, vector<1x128xf32>
    %98 = vector.broadcast %97 : vector<1x128xf32> to vector<128x128xf32>
    %99 = arith.addf %96, %98 : vector<128x128xf32>
    %c0_59 = arith.constant 0 : index
    %c0_60 = arith.constant 0 : index
    %c0_61 = arith.constant 0 : index
    %100 = vector.load %arg2[%c0_59, %c0_60, %c0_61] : memref<1x128x128xf32, #tpu.memory_space<vmem>>, vector<1x128x128xf32>
    %101 = vector.shape_cast %100 : vector<1x128x128xf32> to vector<128x128xf32>
    %102 = arith.addf %99, %101 : vector<128x128xf32>
    %cst_62 = arith.constant 0.000000e+00 : f32
    %103 = vector.broadcast %cst_62 : f32 to vector<128x128xf32>
    %104 = arith.maximumf %102, %103 : vector<128x128xf32>
    %c0_63 = arith.constant 0 : index
    %c0_64 = arith.constant 0 : index
    %c0_65 = arith.constant 0 : index
    %105 = vector.load %arg10[%c0_63, %c0_64, %c0_65] : memref<1x128x128xf32, #tpu.memory_space<vmem>>, vector<1x128x128xf32>
    %106 = vector.shape_cast %105 : vector<1x128x128xf32> to vector<128x128xf32>
    %107 = vector.shape_cast %104 : vector<128x128xf32> to vector<1x128x128xf32>
    tpu.vector_store %arg10[%c0_63, %c0_64, %c0_65], %107 {strides = array<i32>} : memref<1x128x128xf32, #tpu.memory_space<vmem>>, vector<1x128x128xf32>,
    return
  }
  func.func @transform_0(%arg0: i32, %arg1: i32) -> (i32, i32, i32) {
    %c0_i32 = arith.constant 0 : i32
    %c0_i32_0 = arith.constant 0 : i32
    return %arg0, %arg1, %c0_i32 : i32, i32, i32
  }
  func.func @transform_1(%arg0: i32, %arg1: i32) -> (i32, i32, i32, i32) {
    %c0_i32 = arith.constant 0 : i32
    %c0_i32_0 = arith.constant 0 : i32
    %c0_i32_1 = arith.constant 0 : i32
    return %arg0, %arg1, %c0_i32, %c0_i32_0 : i32, i32, i32, i32
  }
  func.func @transform_2(%arg0: i32, %arg1: i32) -> (i32, i32) {
    %c0_i32 = arith.constant 0 : i32
    %c0_i32_0 = arith.constant 0 : i32
    %c0_i32_1 = arith.constant 0 : i32
    return %c0_i32, %c0_i32_0 : i32, i32
  }
  func.func @transform_3(%arg0: i32, %arg1: i32) -> (i32, i32) {
    %c0_i32 = arith.constant 0 : i32
    %c0_i32_0 = arith.constant 0 : i32
    %c0_i32_1 = arith.constant 0 : i32
    return %c0_i32, %c0_i32_0 : i32, i32
  }
  func.func @transform_4(%arg0: i32, %arg1: i32) -> (i32, i32, i32) {
    %c0_i32 = arith.constant 0 : i32
    %c0_i32_0 = arith.constant 0 : i32
    %c0_i32_1 = arith.constant 0 : i32
    %c0_i32_2 = arith.constant 0 : i32
    return %c0_i32, %c0_i32_0, %c0_i32_1 : i32, i32, i32
  }
  func.func @transform_5(%arg0: i32, %arg1: i32) -> (i32, i32) {
    %c0_i32 = arith.constant 0 : i32
    %c0_i32_0 = arith.constant 0 : i32
    %c0_i32_1 = arith.constant 0 : i32
    return %c0_i32, %c0_i32_0 : i32, i32
  }
  func.func @transform_6(%arg0: i32, %arg1: i32) -> (i32, i32) {
    %c0_i32 = arith.constant 0 : i32
    %c0_i32_0 = arith.constant 0 : i32
    %c0_i32_1 = arith.constant 0 : i32
    return %c0_i32, %c0_i32_0 : i32, i32
  }
  func.func @transform_7(%arg0: i32, %arg1: i32) -> (i32, i32) {
    %c0_i32 = arith.constant 0 : i32
    %c0_i32_0 = arith.constant 0 : i32
    %c0_i32_1 = arith.constant 0 : i32
    return %c0_i32, %c0_i32_0 : i32, i32
  }
  func.func @transform_8(%arg0: i32, %arg1: i32) -> (i32, i32, i32) {
    %c0_i32 = arith.constant 0 : i32
    %c0_i32_0 = arith.constant 0 : i32
    return %arg0, %arg1, %c0_i32 : i32, i32, i32
  }
}

</mosaic_0001>

<bundles_post_ra>
// kernel: tpu_custom_call.1
= control target key start
LH: loop header
LB: loop body
LE: loop exit
PB: predicated region body
PF: predicated region fallthrough
CT: control target
= control target key end

     0   :  { %s4964_s0 = inlined_call_operand.hbm [shape: f32[2,256,128], index: 0, kind: input, shape index: {}]   ;;  %s4965_s1 = inlined_call_operand.hbm [shape: f32[2,2,32,128], index: 1, kind: input, shape index: {}]   ;;  %s4966_s2 = inlined_call_operand.hbm [shape: bf16[128,128], index: 2, kind: input, shape index: {}]   ;;  %s4967_s3 = inlined_call_operand.vmem [shape: f32[1,128], index: 3, kind: input, shape index: {}]   ;;  %s4968_s4 = inlined_call_operand.hbm [shape: bf16[1,1152,128], index: 4, kind: input, shape index: {}]   ;;  %s4969_s5 = inlined_call_operand.vmem [shape: f32[1,128], index: 5, kind: input, shape index: {}]   ;;  %s4970_s6 = inlined_call_operand.hbm [shape: bf16[128,128], index: 6, kind: input, shape index: {}]   ;;  %s4971_s7 = inlined_call_operand.vmem [shape: f32[1,128], index: 7, kind: input, shape index: {}]   ;;  %s4972_s8 = inlined_call_operand.hbm [shape: f32[2,256,128], index: 8, kind: output, shape index: {}]  }
   0x1   :  { %4981 = sst [smem:[#allocation26_spill]] %s4966_s2 }
   0x2   :  { %4982 = sst [smem:[#allocation27_spill]] %s4968_s4 }
   0x3   :  { %4983 = sst [smem:[#allocation28_spill]] %s4969_s5 }
   0x4   :  { %4984 = sst [smem:[#allocation29_spill]] %s4970_s6 }
   0x5   :  { %4985 = sst [smem:[#allocation30_spill]] %s4971_s7 }
   0x6   :  { %4986 = sst [smem:[#allocation31_spill]] %s4972_s8 }
   0x7   :  { %13 = vsyncpa [#allocation4], 0 }
   0x8   :  { %15 = vsyncpa [#allocation4 + $0x1], 0 }
   0x9   :  { %16 = vsyncpa [#allocation7], 0 }
   0xa   :  { %18 = vsyncpa [#allocation7 + $0x1], 0 }
   0xb   :  { %19 = vsyncpa [#allocation10], 0 }
   0xc   :  { %20 = vsyncpa [#allocation5], 0 }
   0xd   :  { %22 = vsyncpa [#allocation5 + $0x1], 0  ;;  %s4182_s27 = smov 0   ;;  %s4184_s28 = smov 0  }
   0xe   :  { %s4186_s29 = smov 0   ;;  %s4188_s30 = smov 0  }
   0xf   :  { %s4190_s9 = smov 0   ;;  %s4192_s10 = smov 0  }
  0x10   :  { %s4194_s11 = smov 0   ;;  %s4196_s12 = smov 0  }
  0x11 LB: > { %4987 = sst [smem:[#allocation18_spill]] %s4098_s27  ;;  %s4223_s13 = sadd.s32 4294967295, %s4126_s12   ;;  %s4126_s12 = sphi %s4196_s12, %s28_s12   ;;  %s4122_s11 = sphi %s4194_s11, %s5023_s11   ;;  %s4118_s10 = sphi %s4192_s10, %s5022_s10   ;;  %s4114_s9 = sphi %s4190_s9, %s5021_s9   ;;  %s4110_s30 = sphi %s4188_s30, %s5020_s30   ;;  %s4106_s29 = sphi %s4186_s29, %s5015_s29   ;;  %s4102_s28 = sphi %s4184_s28, %s5019_s28   ;;  %s4098_s27 = sphi %s4182_s27, %s5018_s27  }
  0x12   : > { %4988 = sst [smem:[#allocation19_spill]] %s4106_s29  ;;  %s3252_s14 = sadd.s32 4294967294, %s4126_s12  }
  0x13   : > { %4989 = sst [smem:[#allocation20_spill]] %s4114_s9  ;;  %p62_p0 = scmp.ne.s32.totalorder %s4102_s28, %s4098_s27 }
  0x14   : > { %p63_p1 = scmp.eq.s32.totalorder %s4223_s13, 0  ;;  %p242_p2 = scmp.eq.s32.totalorder %s4223_s13, 3 }
  0x15   : > { %p248_p3 = scmp.eq.s32.totalorder %s3252_s14, 3  ;;  %p3253_p5 = scmp.ge.s32.totalorder %s4126_s12, 1 }
  0x16   : > { %p4232_p4 = por %p63_p1, %p62_p0  ;;  %p255_p7 = scmp.lt.s32.totalorder %s4126_s12, 5 }
  0x17   : > { %p4237_p6 = por %p248_p3, %p62_p0  ;;  %s4993_s2 = sld [smem:[#allocation26_spill]] }
  0x18   : > { %p4245_p8 = pnand %p3253_p5, %p255_p7  ;;  %s4128_s21 = smov [#allocation8]  }
  0x19   : > { %s4991_s16 = scalar_select %p4237_p6, 1, 0 }
  0x1a   : > { %p3761_p9 = pneg %p4245_p8  ;;  %s268_s22 = sshll.u32 %s4128_s21, 4  ;;  %s269_s22 = int_to_ptr.vmem [resolvable:$true] %s268_s22 }
  0x1b   : > { %4992 = sst [smem:[#allocation21_spill]] %s4991_s16  ;;  %s4129_s14 = smov 64  }
  0x1c   : > { %p4253_p10 = pnand %p3761_p9, %p63_p1  ;;  %s4996_s4 = sld [smem:[#allocation27_spill]] }
  0x1d   : > { %s266_s19 = sshll.u32 %s4993_s2, 4  ;;  %s4130_s17 = smov 4   ;;  %s267_s19 = int_to_ptr.hbm [resolvable:$true] %s266_s19 }
  0x1e   : > { %3764 = dma.hbm_to_vmem [thread:$0]  (!%p4253_p10), %s267_s19, 1024, %s269_s22, [#allocation7], %s4129_s14, %s4129_s14, %s4130_s17  }
  0x1f   : > { %s4131_s18 = smov [#allocation9]   ;;  %s4997_s6 = sld [smem:[#allocation29_spill]] }
  0x20   : > { %s285_s21 = sshll.u32 %s4131_s18, 4  ;;  %s4132_s25 = smov [#allocation11]   ;;  %s286_s21 = int_to_ptr.vmem [resolvable:$true] %s285_s21 }
  0x21   : > { %s37_s19 = sadd.s32 1, %s4118_s10  ;;  %s40_s2 = sadd.s32 1, %s4122_s11 }
  0x22   : > { %s283_s26 = sshll.u32 %s4996_s4, 4  ;;  %s302_s4 = sshll.u32 %s4132_s25, 4  ;;  %s284_s26 = int_to_ptr.hbm [resolvable:$true] %s283_s26  ;;  %s303_s4 = int_to_ptr.vmem [resolvable:$true] %s302_s4 }
  0x23   : > { %3767 = dma.hbm_to_vmem [thread:$0]  (!%p4253_p10), %s284_s26, 9216, %s286_s21, [#allocation10], %s4129_s14, %s4129_s14, %s4130_s17  }
  0x24   : > { %p38_p11 = scmp.ge.s32.totalorder %s37_s19, 2  ;;  %s49_s16 = sadd.s32 1, %s4106_s29 }
  0x25   : > { %s300_s24 = sshll.u32 %s4997_s6, 4  ;;  %p56_p12 = scmp.ne.s32.totalorder %s4106_s29, %s4102_s28  ;;  %s301_s24 = int_to_ptr.hbm [resolvable:$true] %s300_s24 }
  0x26   : > { %3770 = dma.hbm_to_vmem [thread:$0]  (!%p4253_p10), %s301_s24, 1024, %s303_s4, [#allocation10], %s4129_s14, %s4129_s14, %s4130_s17  }
  0x27   : > { %s5025_s19 = smov (%p38_p11, %s37_s19), 0  ;;  %s5027_s2 = smov (!%p38_p11, %s40_s2), %s4122_s11 }
  0x28   : > { %4998 = sst [smem:[#allocation22_spill]] %s5025_s19  ;;  %s45_s22 = ssub.s32 %s4118_s10, %s5025_s19 }
  0x29   : > { %p57_p13 = scmp.eq.s32.totalorder %s4126_s12, 0  ;;  %p42_p0 = scmp.ge.s32.totalorder %s5027_s2, 2 }
  0x2a   : > { %p4282_p3 = por %p242_p2, %p56_p12  ;;  %p3785_p7 = scmp.lt.s32.totalorder %s4126_s12, 4 }
  0x2b   : > { %p4286_p5 = por %p57_p13, %p56_p12  ;;  %s5029_s2 = smov (%p42_p0, %s5027_s2), 0 }
  0x2c   : > { %s4999_s23 = scalar_select %p4282_p3, 1, 0 }
  0x2d   : > { %5002 = sst [smem:[#allocation24_spill]] %s5029_s2  ;;  %s319_s26 = sand.u32 1, %s4106_s29  }
  0x2e   : > { %5000 = sst [smem:[#allocation23_spill]] %s4999_s23  ;;  %s3259_s14 = sshll.u32 %s4118_s10, 4 }
  0x2f   : > { %s44_s17 = ssub.s32 %s4122_s11, %s5029_s2  ;;  %s3258_s21 = sshll.u32 %s319_s26, 7 }
  0x30   : > { %s46_s18 = sor.u32 %s45_s22, %s44_s17  ;;  %s3260_s24 = sshll.u32 %s4122_s11, 5 }
  0x31   : > { %p47_p9 = scmp.eq.s32.totalorder %s46_s18, 0  ;;  %s323_s25 = scalar_lea.vmem [#allocation3], %s3258_s21 }
  0x32   : > { %s333_s6 = sshll.u32 %s323_s25, 4  ;;  %s328_s27 = sadd.s32 %s3260_s24, %s3259_s14  ;;  %s334_s6 = int_to_ptr.vmem [resolvable:$true] %s333_s6 }
  0x33   : > { %s4299_s19 = scalar_select %p47_p9, %s4106_s29, %s49_s16  }
  0x34   : > { %s3261_s23 = sshll.u32 %s328_s27, 3  ;;  %p4305_p2 = pnand %p3785_p7, %p4286_p5 }
  0x35   : > { %5003 = sst [smem:[#allocation25_spill]] %s4299_s19  ;;  %s330_s18 = scalar_lea.hbm %s4964_s0, %s3261_s23 }
  0x36   : > { %s331_s21 = sshll.u32 %s330_s18, 4  ;;  %s320_s25 = scalar_lea.sflag [#allocation4], %s319_s26  ;;  %s332_s21 = int_to_ptr.hbm [resolvable:$true] %s331_s21 }
  0x37   : > { %s4133_s2 = smov 128   ;;  %s4134_s16 = smov 8  }
  0x38   : > { %3774 = dma.hbm_to_vmem [thread:$0]  (!%p4305_p2), %s332_s21, 2048, %s334_s6, %s320_s25, %s4133_s2, %s4133_s2, %s4134_s16  }
  0x39   : > { %s3262_s27 = sshll.u32 %s319_s26, 5  ;;  %s343_s4 = sand.u32 1, %s4126_s12  }
  0x3a   : > { %s3263_s14 = sshll.u32 %s4118_s10, 2  ;;  %s3264_s24 = sshll.u32 %s4122_s11, 3 }
  0x3b   : > { %s352_s19 = sadd.s32 %s3264_s24, %s3263_s14  ;;  %s347_s29 = scalar_lea.vmem [#allocation6], %s3262_s27 }
  0x3c   : > { %s357_s9 = sshll.u32 %s347_s29, 4  ;;  %s3265_s7 = sshll.u32 %s352_s19, 3  ;;  %s358_s9 = int_to_ptr.vmem [resolvable:$true] %s357_s9 }
  0x3d   : > { %s354_s23 = scalar_lea.hbm %s4965_s1, %s3265_s7  ;;  %s344_s18 = scalar_lea.sflag [#allocation7], %s343_s4 }
  0x3e   : > { %s355_s17 = sshll.u32 %s354_s23, 4  ;;  %369 = sbr.rel (%p4245_p8) target bundleno = 907 (0x38b), region = 52  ;;  %s356_s17 = int_to_ptr.hbm [resolvable:$true] %s355_s17 }
  0x3f   : > { %3777 = dma.hbm_to_vmem [thread:$0]  (!%p4305_p2), %s356_s17, 512, %s358_s9, %s344_s18, %s4133_s2, %s4133_s2, %s4134_s16  }
  0x40   : > { %s4325_s6 = sand.u32 (!%p4245_p8), 1, %s4102_s28  }
  0x41   : > { %s3267_s29 = sshll.u32 (!%p4245_p8), %s4325_s6, 7  ;;  %s372_s19 = scalar_lea.sflag (!%p4245_p8), [#allocation4], %s4325_s6 }
  0x42   : > { %s4331_s5 = scalar_lea.vmem (!%p4245_p8), [#allocation3], %s3267_s29 }
  0x43   : > { %4077 = dma.done.wait (%p4232_p4), %s372_s19, 2048  }
  0x44   : > { %4079 = vsyncadd (%p4232_p4), %s372_s19, 4294965248  ;;  %s381_s7 = sand.u32 1, %s4223_s13   ;;  %s3268_s8 = sshll.u32 %s4325_s6, 5 }
  0x45   : > { %s382_s9 = scalar_lea.sflag [#allocation7], %s381_s7  ;;  %s4339_s20 = scalar_lea.vmem [#allocation6], %s3268_s8 }
  0x46   : > { %4081 = dma.done.wait (%p4232_p4), %s382_s9, 512  }
  0x47   : > { %4083 = vsyncadd (%p4232_p4), %s382_s9, 4294966784 }
  0x48   : > { %4085 = dma.done.wait (%p63_p1), [#allocation7], 1024  }
  0x49   : > { %4087 = vsyncadd (%p63_p1), [#allocation7], 4294966272 }
  0x4a   : > { %4089 = dma.done.wait (%p63_p1), [#allocation10], 10240  }
  0x4b   : > { %4091 = vsyncadd (%p63_p1), [#allocation10], 4294957056  ;;  %v3638_v0 = vld [vmem:[#allocation8 + $0x38] sm:$0xff]  ;;  %v3637_v1 = vld [vmem:[#allocation8 + $0x30] sm:$0xff]  ;;  %p627_p1 = scmp.eq.s32.totalorder %s4110_s30, 0  ;;  %vm641_vm1 = vcmask 1040384  }
  0x4c   : > { %533 = vmatpush.bf16.msra.mxu0 %v3638_v0  ;;  %604 = vmatpush.bf16.msra.mxu1 %v3638_v0  ;;  %v3636_v2 = vld [vmem:[#allocation8 + $0x28] sm:$0xff]  ;;  %v3635_v3 = vld [vmem:[#allocation8 + $0x20] sm:$0xff]  ;;  %v3634_v4 = vld [vmem:[#allocation8 + $0x18] sm:$0xff]  ;;  %vm836_vm2 = vcmask 1046528   ;;  %vm909_vm3 = vcmask 1045504   ;;  %p633_p4 = scmp.eq.s32.totalorder %s4110_s30, 1 }
  0x4d   : > { %v3633_v5 = vld [vmem:[#allocation8 + $0x10] sm:$0xff]  ;;  %v3632_v6 = vld [vmem:[#allocation8 + $0x8] sm:$0xff]  ;;  %v3631_v7 = vld [vmem:[#allocation8] sm:$0xff]  ;;  %s628_s13 = scalar_select %p627_p1, 1, 0 }
  0x4e   : > { %v441_v8 = vld [vmem:[%s4331_s5] sm:$0xff]  ;;  %v442_v9 = vld [vmem:[%s4331_s5 + $0x8] sm:$0xff]  ;;  %v443_v14 = vld [vmem:[%s4331_s5 + $0x10] sm:$0xff]  ;;  %s634_s26 = scalar_select %p633_p4, 1, 0 }
  0x4f   : > { %v598_v10 = vld [vmem:[%s4339_s20] sm:$0xff]  ;;  %v599_v11 = vld [vmem:[%s4339_s20 + $0x8] sm:$0xff]  ;;  %v457_v12 = vpack.c.bf16 %v442_v9, %v441_v8  ;;  %v444_v15 = vld [vmem:[%s4331_s5 + $0x18] sm:$0xff]  ;;  %v629_v8 = vstv %s628_s13  ;;  %s5007_s16 = sld [smem:[#allocation28_spill]]  ;;  %s4871_s24 = scalar_lea.vmem [#allocation12], %s3267_s29 }
  0x50   : > { %534 = vmatpush.bf16.msra.mxu0 %v3637_v1  ;;  %605 = vmatpush.bf16.msra.mxu1 %v3637_v1  ;;  %v602_v13 = vpack.c.bf16 %v599_v11, %v598_v10  ;;  %v458_v16 = vpack.c.bf16 %v444_v15, %v443_v14  ;;  %v445_v17 = vld [vmem:[%s4331_s5 + $0x20] sm:$0xff]  ;;  %v446_v18 = vld [vmem:[%s4331_s5 + $0x28] sm:$0xff]  ;;  %v447_v20 = vld [vmem:[%s4331_s5 + $0x30] sm:$0xff]  ;;  %vm4381_vm0 = vcmp.eq.s32.totalorder %v629_v8, 1  ;;  %s5008_s14 = sld [smem:[#allocation30_spill]]  ;;  %s3626_s23 = sshll.u32 %s4110_s30, 4 }
  0x51   : > { %v459_v19 = vpack.c.bf16 %v446_v18, %v445_v17  ;;  %v448_v21 = vld [vmem:[%s4331_s5 + $0x38] sm:$0xff]  ;;  %v449_v23 = vld [vmem:[%s4331_s5 + $0x40] sm:$0xff]  ;;  %v450_v24 = vld [vmem:[%s4331_s5 + $0x48] sm:$0xff]  ;;  %s5009_s22 = sld [smem:[#allocation20_spill]]  ;;  %s3104_s30 = sshll.u32 %s4871_s24, 4  ;;  %s3105_s30 = int_to_ptr.vmem [resolvable:$true] %s3104_s30 }
  0x52   : > { %v460_v22 = vpack.c.bf16 %v448_v21, %v447_v20  ;;  %v461_v25 = vpack.c.bf16 %v450_v24, %v449_v23  ;;  %v451_v26 = vld [vmem:[%s4331_s5 + $0x50] sm:$0xff]  ;;  %v452_v27 = vld [vmem:[%s4331_s5 + $0x58] sm:$0xff]  ;;  %v3668_v37 = vld [vmem:[#allocation9 + $0xe8] sm:$0xff]  ;;  %s5010_s8 = sld [smem:[#allocation31_spill]]  ;;  %s3090_s15 = scalar_lea.sflag [#allocation5], %s4325_s6 }
  0x53   : > { %v462_v28 = vpack.c.bf16 %v452_v27, %v451_v26  ;;  %v3670_v29 = vld [vmem:[#allocation9 + $0xf8] sm:$0xff]  ;;  %v3669_v33 = vld [vmem:[#allocation9 + $0xf0] sm:$0xff]  ;;  %v453_v38 = vld [vmem:[%s4331_s5 + $0x60] sm:$0xff] }
  0x54   : > { %535 = vmatpush.bf16.msra.mxu0 %v3636_v2  ;;  %606 = vmatpush.bf16.msra.mxu1 %v3636_v2  ;;  %v3646_v30 = vld [vmem:[#allocation9 + $0x38] sm:$0xff]  ;;  %v3645_v34 = vld [vmem:[#allocation9 + $0x30] sm:$0xff]  ;;  %v454_v39 = vld [vmem:[%s4331_s5 + $0x68] sm:$0xff] }
  0x55   : > { %v3678_v31 = vld [vmem:[#allocation9 + $0x138] sm:$0xff]  ;;  %1718 = vmatpush.bf16.msra.mxu2 %v3670_v29  ;;  %v3677_v35 = vld [vmem:[#allocation9 + $0x130] sm:$0xff]  ;;  %v3644_v40 = vld [vmem:[#allocation9 + $0x28] sm:$0xff]  ;;  %v463_v41 = vpack.c.bf16 %v454_v39, %v453_v38 }
  0x56   : > { %v3686_v32 = vld [vmem:[#allocation9 + $0x178] sm:$0xff]  ;;  %1767 = vmatpush.bf16.msra.mxu3 %v3678_v31  ;;  %v3685_v36 = vld [vmem:[#allocation9 + $0x170] sm:$0xff]  ;;  %v3676_v42 = vld [vmem:[#allocation9 + $0x128] sm:$0xff] }
  0x57   : > { %v3684_v43 = vld [vmem:[#allocation9 + $0x168] sm:$0xff]  ;;  %v3667_v44 = vld [vmem:[#allocation9 + $0xe0] sm:$0xff]  ;;  %v3666_v48 = vld [vmem:[#allocation9 + $0xd8] sm:$0xff]  ;;  %s3627_s17 = sshll.u32 %s5009_s22, 5 }
  0x58   : > { %536 = vmatpush.bf16.msra.mxu0 %v3635_v3  ;;  %607 = vmatpush.bf16.msra.mxu1 %v3635_v3  ;;  %v3643_v45 = vld [vmem:[#allocation9 + $0x20] sm:$0xff]  ;;  %v3642_v49 = vld [vmem:[#allocation9 + $0x18] sm:$0xff]  ;;  %v600_v50 = vld [vmem:[%s4339_s20 + $0x10] sm:$0xff]  ;;  %s3101_s18 = sadd.s32 %s3627_s17, %s3626_s23 }
  0x59   : > { %1719 = vmatpush.bf16.msra.mxu2 %v3669_v33  ;;  %v3675_v46 = vld [vmem:[#allocation9 + $0x120] sm:$0xff]  ;;  %v601_v51 = vld [vmem:[%s4339_s20 + $0x18] sm:$0xff]  ;;  %v3665_v55 = vld [vmem:[#allocation9 + $0xd0] sm:$0xff]  ;;  %s3628_s29 = sshll.u32 %s3101_s18, 3 }
  0x5a   : > { %1768 = vmatpush.bf16.msra.mxu3 %v3677_v35  ;;  %v3683_v47 = vld [vmem:[#allocation9 + $0x160] sm:$0xff]  ;;  %v603_v52 = vpack.c.bf16 %v601_v51, %v600_v50  ;;  %v3674_v53 = vld [vmem:[#allocation9 + $0x118] sm:$0xff]  ;;  %v3641_v56 = vld [vmem:[#allocation9 + $0x10] sm:$0xff]  ;;  %s3103_s9 = scalar_lea.hbm %s5010_s8, %s3628_s29 }
  0x5b   : > { %v3682_v54 = vld [vmem:[#allocation9 + $0x158] sm:$0xff]  ;;  %v455_v57 = vld [vmem:[%s4331_s5 + $0x70] sm:$0xff]  ;;  %v3664_v61 = vld [vmem:[#allocation9 + $0xc8] sm:$0xff]  ;;  %s3106_s13 = sshll.u32 %s3103_s9, 4  ;;  %s3107_s13 = int_to_ptr.hbm [resolvable:$true] %s3106_s13 }
  0x5c   : > { %537 = vmatpush.bf16.msra.mxu0 %v3634_v4  ;;  %608 = vmatpush.bf16.msra.mxu1 %v3634_v4  ;;  %v456_v58 = vld [vmem:[%s4331_s5 + $0x78] sm:$0xff]  ;;  %v3673_v59 = vld [vmem:[#allocation9 + $0x110] sm:$0xff]  ;;  %v3640_v62 = vld [vmem:[#allocation9 + $0x8] sm:$0xff]  ;;  %s4030_s2 = sshra.s32 %s3107_s13, 4  ;;  %s4031_s2 = int_to_ptr.hbm [resolvable:$true] %s4030_s2 }
  0x5d   : > { %1720 = vmatpush.bf16.msra.mxu2 %v3668_v37  ;;  %v3681_v60 = vld [vmem:[#allocation9 + $0x150] sm:$0xff]  ;;  %v464_v63 = vpack.c.bf16 %v456_v58, %v455_v57  ;;  %v3672_v0 = vld [vmem:[#allocation9 + $0x108] sm:$0xff]  ;;  %v3663_v2 = vld [vmem:[#allocation9 + $0xc0] sm:$0xff]  ;;  %p4037_p12 = scmp.lt.s32.totalorder %s4031_s2, %s5010_s8 }
  0x5e   : > { %1769 = vmatpush.bf16.msra.mxu3 %v3676_v42  ;;  %v3680_v1 = vld [vmem:[#allocation9 + $0x148] sm:$0xff]  ;;  %v3639_v3 = vld [vmem:[#allocation9] sm:$0xff]  ;;  %v3653_v21 = vld [vmem:[#allocation9 + $0x70] sm:$0xff] }
  0x5f   : > { %v3671_v4 = vld [vmem:[#allocation9 + $0x100] sm:$0xff] }
  0x60   : > { %538 = vmatpush.bf16.msra.mxu0 %v3633_v5  ;;  %609 = vmatpush.bf16.msra.mxu1 %v3633_v5  ;;  %v3679_v5 = vld [vmem:[#allocation9 + $0x140] sm:$0xff] }
  0x61   : > { %1721 = vmatpush.bf16.msra.mxu2 %v3667_v44 }
  0x62   : > { %1770 = vmatpush.bf16.msra.mxu3 %v3675_v46 }
  0x64   : > { %539 = vmatpush.bf16.msra.mxu0 %v3632_v6  ;;  %610 = vmatpush.bf16.msra.mxu1 %v3632_v6  ;;  %v3654_v6 = vld [vmem:[#allocation9 + $0x78] sm:$0xff] }
  0x65   : > { %1722 = vmatpush.bf16.msra.mxu2 %v3666_v48 }
  0x66   : > { %1771 = vmatpush.bf16.msra.mxu3 %v3674_v53 }
  0x68   : > { %540 = vmatpush.bf16.msra.mxu0 %v3631_v7  ;;  %611 = vmatpush.bf16.msra.mxu1 %v3631_v7  ;;  %v4377_v7 = vld [vmem:[%s4967_s3] ss:$0 sm:$0xff] }
  0x69   : > { %1723 = vmatpush.bf16.msra.mxu2 %v3665_v55 }
  0x6a   : > { %1772 = vmatpush.bf16.msra.mxu3 %v3673_v59 }
  0x6b   : > { %541 = vmatmul.bf16.vlgmr.msra.gmra.mxu0 %v457_v12  ;;  %612 = vmatmul.bf16.vlgmr.msra.gmra.mxu1 %v602_v13 }
  0x6c   : > { %2009 = vmatpush.bf16.msrb.mxu0 %v3646_v30  ;;  %1816 = vmatpush.bf16.msrb.mxu1 %v3686_v32 }
  0x6d   : > { %1724 = vmatpush.bf16.msra.mxu2 %v3664_v61 }
  0x6e   : > { %1773 = vmatpush.bf16.msra.mxu3 %v3672_v0 }
  0x70   : > { %2010 = vmatpush.bf16.msrb.mxu0 %v3645_v34  ;;  %1817 = vmatpush.bf16.msrb.mxu1 %v3685_v36 }
  0x71   : > { %1725 = vmatpush.bf16.msra.mxu2 %v3663_v2 }
  0x72   : > { %1774 = vmatpush.bf16.msra.mxu3 %v3671_v4 }
  0x74   : > { %2011 = vmatpush.bf16.msrb.mxu0 %v3644_v40  ;;  %1818 = vmatpush.bf16.msrb.mxu1 %v3684_v43 }
  0x75   : > { %2058 = vmatpush.bf16.msrb.mxu2 %v3654_v6 }
  0x78   : > { %2012 = vmatpush.bf16.msrb.mxu0 %v3643_v45  ;;  %1819 = vmatpush.bf16.msrb.mxu1 %v3683_v47 }
  0x79   : > { %2059 = vmatpush.bf16.msrb.mxu2 %v3653_v21 }
  0x7b   : > { %546 = vmatmul.bf16.gmra.mxu0 %v458_v16  ;;  %617 = vmatmul.bf16.gmra.mxu1 %v603_v52 }
  0x7c   : > { %2013 = vmatpush.bf16.msrb.mxu0 %v3642_v49  ;;  %1820 = vmatpush.bf16.msrb.mxu1 %v3682_v54 }
  0x80   : > { %2014 = vmatpush.bf16.msrb.mxu0 %v3641_v56  ;;  %1821 = vmatpush.bf16.msrb.mxu1 %v3681_v60 }
  0x84   : > { %2015 = vmatpush.bf16.msrb.mxu0 %v3640_v62  ;;  %1822 = vmatpush.bf16.msrb.mxu1 %v3680_v1  ;;  %v3652_v1 = vld [vmem:[#allocation9 + $0x68] sm:$0xff] }
  0x85   : > { %2060 = vmatpush.bf16.msrb.mxu2 %v3652_v1 }
  0x88   : > { %2016 = vmatpush.bf16.msrb.mxu0 %v3639_v3  ;;  %1823 = vmatpush.bf16.msrb.mxu1 %v3679_v5 }
  0x8b   : > { %551 = vmatmul.bf16.gmra.mxu0 %v459_v19 }
  0x9b   : > { %556 = vmatmul.bf16.gmra.mxu0 %v460_v22 }
  0xab   : > { %561 = vmatmul.bf16.gmra.mxu0 %v461_v25 }
  0xbb   : > { %566 = vmatmul.bf16.gmra.mxu0 %v462_v28 }
  0xcb   : > { %571 = vmatmul.bf16.gmra.mxu0 %v463_v41 }
  0xdb   : > { %576 = vmatmul.bf16.gmra.mxu0 %v464_v63 }
  0xe8   : > { %v542_v9 = vpop.f32.mrf.mxu0  ;;  %v613_v10 = vpop.f32.mrf.mxu1 }
  0xe9   : > { %v543_v11 = vadd.f32 %v4377_v7, %v542_v9  ;;  %v614_v12 = vadd.f32 %v4377_v7, %v613_v10 }
  0xeb   : > { %v582_v14 = vmax.f32 %v543_v11, 0.0  ;;  %v623_v15 = vmax.f32 %v614_v12, 0.0 }
  0xed   : > { %v631_v16 = vsel %vm4381_vm0, 0.0, %v623_v15  ;;  %v669_v17 = vrot.slane %v582_v14, 7 }
  0xee   : > { %v642_v18 = vrot.slane %v631_v16, 7 }
  0xef   : > { %v717_v24 = vsel %vm641_vm1, 0.0, %v669_v17 }
  0xf0   : > { %v544_v19 = vpop.f32.mrf.mxu0  ;;  %v615_v20 = vpop.f32.mrf.mxu1  ;;  %v4391_v27 = vsel %vm641_vm1, 0.0, %v642_v18  ;;  %v798_v30 = vpack.c.bf16 %v717_v24, %v717_v24  ;;  %v842_v35 = vrot.slane %v717_v24, 1  ;;  %v915_v39 = vrot.slane %v717_v24, 2 }
  0xf1   : > { %v545_v22 = vadd.f32 %v4377_v7, %v544_v19  ;;  %v616_v23 = vadd.f32 %v4377_v7, %v615_v20  ;;  %v796_v34 = vpack.c.bf16 %v4391_v27, %v4391_v27 }
  0xf2   : > { %v1000_v42 = vunpack.c.l.b16 %v798_v30 }
  0xf3   : > { %v583_v25 = vmax.f32 %v545_v22, 0.0  ;;  %v624_v26 = vmax.f32 %v616_v23, 0.0  ;;  %v998_v49 = vunpack.c.l.b16 %v796_v34 }
  0xf5   : > { %v670_v28 = vrot.slane %v583_v25, 7  ;;  %v4395_v29 = vsel %vm4381_vm0, 0.0, %v624_v26 }
  0xf6   : > { %v643_v31 = vrot.slane %v4395_v29, 7 }
  0xf7   : > { %v725_v32 = vsel %vm641_vm1, %v670_v28, 0.0  ;;  %v671_v33 = vsel %vm641_vm1, %v669_v17, %v670_v28 }
  0xf8   : > { %v845_v36 = vrot.slane %v725_v32, 1  ;;  %v547_v37 = vpop.f32.mrf.mxu0  ;;  %v799_v38 = vpack.c.bf16 %v671_v33, %v671_v33  ;;  %v843_v41 = vrot.slane %v671_v33, 1  ;;  %v918_v43 = vrot.slane %v725_v32, 2 }
  0xf9   : > { %v548_v40 = vadd.f32 %v4377_v7, %v547_v37  ;;  %v916_v44 = vrot.slane %v671_v33, 2  ;;  %v4406_v46 = vsel %vm641_vm1, %v642_v18, %v643_v31 }
  0xfa   : > { %v1001_v45 = vunpack.c.l.b16 %v799_v38  ;;  %v797_v48 = vpack.c.bf16 %v4406_v46, %v4406_v46  ;;  %v844_v51 = vsel %vm836_vm2, %v842_v35, %v843_v41  ;;  %v846_v52 = vsel %vm836_vm2, %v843_v41, %v845_v36 }
  0xfb   : > { %v584_v47 = vmax.f32 %v548_v40, 0.0  ;;  %v917_v53 = vsel %vm909_vm3, %v915_v39, %v916_v44  ;;  %v895_v55 = vpack.c.bf16 %v844_v51, %v844_v51  ;;  %v896_v56 = vpack.c.bf16 %v846_v52, %v846_v52 }
  0xfc   : > { %v1015_v50 = vpack.c.b16 %v1001_v45, %v1000_v42  ;;  %v999_v54 = vunpack.c.l.b16 %v797_v48  ;;  %v919_v58 = vsel %vm909_vm3, %v916_v44, %v918_v43  ;;  %v968_v59 = vpack.c.bf16 %v917_v53, %v917_v53  ;;  %v3651_v45 = vld [vmem:[#allocation9 + $0x60] sm:$0xff] }
  0xfd   : > { %v672_v57 = vrot.slane %v584_v47, 7  ;;  %v1048_v61 = vunpack.c.l.b16 %v895_v55  ;;  %v1049_v62 = vunpack.c.l.b16 %v896_v56  ;;  %v969_v0 = vpack.c.bf16 %v919_v58, %v919_v58  ;;  %2061 = vmatpush.bf16.msrb.mxu2 %v3651_v45 }
  0xfe   : > { %1726 = vmatmul.bf16.vlgmr.msra.gmra.mxu2 %v1015_v50  ;;  %v1014_v60 = vpack.c.b16 %v999_v54, %v998_v49  ;;  %v1096_v4 = vunpack.c.l.b16 %v968_v59  ;;  %v838_v29 = vrot.slane %v4406_v46, 1 }
  0xff   : > { %v4415_v3 = vpack.c.b16 %v1049_v62, %v1048_v61  ;;  %v718_v5 = vsel %vm641_vm1, 0.0, %v672_v57  ;;  %v1097_v6 = vunpack.c.l.b16 %v969_v0 }
 0x100   : > { %v549_v63 = vpop.f32.mrf.mxu0  ;;  %2017 = vmatmul.bf16.vlgmr.msrb.gmra.mxu0 %v1014_v60  ;;  %v800_v10 = vpack.c.bf16 %v718_v5, %v718_v5  ;;  %v847_v12 = vrot.slane %v718_v5, 1  ;;  %v920_v13 = vrot.slane %v718_v5, 2 }
 0x101   : > { %v550_v2 = vadd.f32 %v4377_v7, %v549_v63  ;;  %1775 = vmatmul.bf16.vlgmr.msra.gmra.mxu3 %v4415_v3  ;;  %v4419_v9 = vpack.c.b16 %v1097_v6, %v1096_v4 }
 0x102   : > { %v1002_v23 = vunpack.c.l.b16 %v800_v10 }
 0x103   : > { %v585_v8 = vmax.f32 %v550_v2, 0.0  ;;  %1824 = vmatmul.bf16.vlgmr.msrb.gmra.mxu1 %v4419_v9 }
 0x105   : > { %v673_v11 = vrot.slane %v585_v8, 7 }
 0x107   : > { %v674_v14 = vsel %vm641_vm1, %v672_v57, %v673_v11  ;;  %v726_v15 = vsel %vm641_vm1, %v673_v11, 0.0 }
 0x108   : > { %v848_v16 = vrot.slane %v674_v14, 1  ;;  %v850_v17 = vrot.slane %v726_v15, 1  ;;  %v921_v18 = vrot.slane %v674_v14, 2  ;;  %v923_v19 = vrot.slane %v726_v15, 2  ;;  %v552_v20 = vpop.f32.mrf.mxu0 }
 0x109   : > { %v553_v21 = vadd.f32 %v4377_v7, %v552_v20  ;;  %v801_v22 = vpack.c.bf16 %v674_v14, %v674_v14 }
 0x10a   : > { %v849_v24 = vsel %vm836_vm2, %v847_v12, %v848_v16  ;;  %v851_v25 = vsel %vm836_vm2, %v848_v16, %v850_v17  ;;  %v922_v26 = vsel %vm909_vm3, %v920_v13, %v921_v18  ;;  %v924_v28 = vsel %vm909_vm3, %v921_v18, %v923_v19 }
 0x10b   : > { %v586_v30 = vmax.f32 %v553_v21, 0.0  ;;  %v1003_v32 = vunpack.c.l.b16 %v801_v22  ;;  %v897_v33 = vpack.c.bf16 %v849_v24, %v849_v24  ;;  %v898_v34 = vpack.c.bf16 %v851_v25, %v851_v25  ;;  %v3650_v22 = vld [vmem:[#allocation9 + $0x58] sm:$0xff] }
 0x10c   : > { %v970_v35 = vpack.c.bf16 %v922_v26, %v922_v26  ;;  %v971_v36 = vpack.c.bf16 %v924_v28, %v924_v28  ;;  %2062 = vmatpush.bf16.msrb.mxu2 %v3650_v22 }
 0x10d   : > { %v4429_v37 = vpack.c.b16 %v1003_v32, %v1002_v23  ;;  %v1050_v38 = vunpack.c.l.b16 %v897_v33  ;;  %v1051_v39 = vunpack.c.l.b16 %v898_v34  ;;  %v675_v40 = vrot.slane %v586_v30, 7 }
 0x10e   : > { %v1098_v41 = vunpack.c.l.b16 %v970_v35  ;;  %v1099_v42 = vunpack.c.l.b16 %v971_v36 }
 0x10f   : > { %1731 = vmatmul.bf16.gmra.mxu2 %v4429_v37  ;;  %v4432_v43 = vpack.c.b16 %v1051_v39, %v1050_v38  ;;  %v719_v48 = vsel %vm641_vm1, 0.0, %v675_v40 }
 0x110   : > { %v554_v44 = vpop.f32.mrf.mxu0  ;;  %2022 = vmatmul.bf16.gmra.mxu0 %v1015_v50  ;;  %v4436_v49 = vpack.c.b16 %v1099_v42, %v1098_v41  ;;  %v802_v52 = vpack.c.bf16 %v719_v48, %v719_v48  ;;  %v852_v54 = vrot.slane %v719_v48, 1  ;;  %v925_v55 = vrot.slane %v719_v48, 2 }
 0x111   : > { %v555_v47 = vadd.f32 %v4377_v7, %v554_v44  ;;  %1780 = vmatmul.bf16.gmra.mxu3 %v4432_v43 }
 0x112   : > { %v1004_v0 = vunpack.c.l.b16 %v802_v52 }
 0x113   : > { %v587_v51 = vmax.f32 %v555_v47, 0.0  ;;  %1829 = vmatmul.bf16.gmra.mxu1 %v4436_v49 }
 0x115   : > { %v676_v53 = vrot.slane %v587_v51, 7 }
 0x117   : > { %v677_v56 = vsel %vm641_vm1, %v675_v40, %v676_v53  ;;  %v727_v50 = vsel %vm641_vm1, %v676_v53, 0.0 }
 0x118   : > { %v853_v57 = vrot.slane %v677_v56, 1  ;;  %v855_v58 = vrot.slane %v727_v50, 1  ;;  %v926_v59 = vrot.slane %v677_v56, 2  ;;  %v928_v60 = vrot.slane %v727_v50, 2  ;;  %v557_v61 = vpop.f32.mrf.mxu0 }
 0x119   : > { %v558_v62 = vadd.f32 %v4377_v7, %v557_v61  ;;  %v803_v63 = vpack.c.bf16 %v677_v56, %v677_v56 }
 0x11a   : > { %v854_v1 = vsel %vm836_vm2, %v852_v54, %v853_v57  ;;  %v856_v2 = vsel %vm836_vm2, %v853_v57, %v855_v58  ;;  %v927_v4 = vsel %vm909_vm3, %v925_v55, %v926_v59  ;;  %v929_v5 = vsel %vm909_vm3, %v926_v59, %v928_v60 }
 0x11b   : > { %v588_v6 = vmax.f32 %v558_v62, 0.0  ;;  %v1005_v8 = vunpack.c.l.b16 %v803_v63  ;;  %v899_v10 = vpack.c.bf16 %v854_v1, %v854_v1  ;;  %v900_v11 = vpack.c.bf16 %v856_v2, %v856_v2  ;;  %v3649_v2 = vld [vmem:[#allocation9 + $0x50] sm:$0xff] }
 0x11c   : > { %v972_v12 = vpack.c.bf16 %v927_v4, %v927_v4  ;;  %v973_v13 = vpack.c.bf16 %v929_v5, %v929_v5  ;;  %2063 = vmatpush.bf16.msrb.mxu2 %v3649_v2  ;;  %v910_v2 = vrot.slane %v4391_v27, 2 }
 0x11d   : > { %v4447_v14 = vpack.c.b16 %v1005_v8, %v1004_v0  ;;  %v1052_v15 = vunpack.c.l.b16 %v899_v10  ;;  %v1053_v16 = vunpack.c.l.b16 %v900_v11  ;;  %v678_v17 = vrot.slane %v588_v6, 7 }
 0x11e   : > { %v1100_v18 = vunpack.c.l.b16 %v972_v12  ;;  %v1101_v19 = vunpack.c.l.b16 %v973_v13 }
 0x11f   : > { %1736 = vmatmul.bf16.gmra.mxu2 %v4447_v14  ;;  %v4450_v20 = vpack.c.b16 %v1053_v16, %v1052_v15  ;;  %v720_v24 = vsel %vm641_vm1, 0.0, %v678_v17 }
 0x120   : > { %v559_v21 = vpop.f32.mrf.mxu0  ;;  %2027 = vmatmul.bf16.gmra.mxu0 %v4429_v37  ;;  %v4455_v25 = vpack.c.b16 %v1101_v19, %v1100_v18  ;;  %v804_v28 = vpack.c.bf16 %v720_v24, %v720_v24  ;;  %v857_v32 = vrot.slane %v720_v24, 1  ;;  %v930_v33 = vrot.slane %v720_v24, 2 }
 0x121   : > { %v560_v23 = vadd.f32 %v4377_v7, %v559_v21  ;;  %1785 = vmatmul.bf16.gmra.mxu3 %v4450_v20 }
 0x122   : > { %v1006_v45 = vunpack.c.l.b16 %v804_v28 }
 0x123   : > { %v589_v26 = vmax.f32 %v560_v23, 0.0  ;;  %1834 = vmatmul.bf16.gmra.mxu1 %v4455_v25 }
 0x125   : > { %v679_v30 = vrot.slane %v589_v26, 7 }
 0x127   : > { %v680_v34 = vsel %vm641_vm1, %v678_v17, %v679_v30  ;;  %v728_v35 = vsel %vm641_vm1, %v679_v30, 0.0 }
 0x128   : > { %v858_v36 = vrot.slane %v680_v34, 1  ;;  %v860_v38 = vrot.slane %v728_v35, 1  ;;  %v931_v39 = vrot.slane %v680_v34, 2  ;;  %v933_v40 = vrot.slane %v728_v35, 2  ;;  %v562_v41 = vpop.f32.mrf.mxu0 }
 0x129   : > { %v563_v42 = vadd.f32 %v4377_v7, %v562_v41  ;;  %v805_v44 = vpack.c.bf16 %v680_v34, %v680_v34 }
 0x12a   : > { %v859_v47 = vsel %vm836_vm2, %v857_v32, %v858_v36  ;;  %v861_v48 = vsel %vm836_vm2, %v858_v36, %v860_v38  ;;  %v932_v51 = vsel %vm909_vm3, %v930_v33, %v931_v39  ;;  %v934_v52 = vsel %vm909_vm3, %v931_v39, %v933_v40 }
 0x12b   : > { %v590_v53 = vmax.f32 %v563_v42, 0.0  ;;  %v1007_v54 = vunpack.c.l.b16 %v805_v44  ;;  %v901_v55 = vpack.c.bf16 %v859_v47, %v859_v47  ;;  %v902_v56 = vpack.c.bf16 %v861_v48, %v861_v48 }
 0x12c   : > { %v974_v50 = vpack.c.bf16 %v932_v51, %v932_v51  ;;  %v975_v57 = vpack.c.bf16 %v934_v52, %v934_v52 }
 0x12d   : > { %v4466_v58 = vpack.c.b16 %v1007_v54, %v1006_v45  ;;  %v1054_v59 = vunpack.c.l.b16 %v901_v55  ;;  %v1055_v60 = vunpack.c.l.b16 %v902_v56  ;;  %v681_v61 = vrot.slane %v590_v53, 7  ;;  %v3694_v53 = vld [vmem:[#allocation9 + $0x1b8] sm:$0xff]  ;;  %v3648_v54 = vld [vmem:[#allocation9 + $0x48] sm:$0xff] }
 0x12e   : > { %v1102_v62 = vunpack.c.l.b16 %v974_v50  ;;  %v1103_v63 = vunpack.c.l.b16 %v975_v57  ;;  %2701 = vmatpush.bf16.msra.mxu1 %v3694_v53  ;;  %2064 = vmatpush.bf16.msrb.mxu2 %v3648_v54  ;;  %v4498_v57 = vsel %vm641_vm1, %v643_v31, 0.0 }
 0x12f   : > { %1741 = vmatmul.bf16.gmra.mxu2 %v4466_v58  ;;  %v4469_v0 = vpack.c.b16 %v1055_v60, %v1054_v59  ;;  %v721_v5 = vsel %vm641_vm1, 0.0, %v681_v61  ;;  %v4501_v60 = vld [vmem:[#allocation9 + $0x1f8] sm:$0xff] }
 0x130   : > { %v564_v1 = vpop.f32.mrf.mxu0  ;;  %2032 = vmatmul.bf16.gmra.mxu0 %v4447_v14  ;;  %v4474_v6 = vpack.c.b16 %v1103_v63, %v1102_v62  ;;  %v806_v10 = vpack.c.bf16 %v721_v5, %v721_v5  ;;  %v862_v12 = vrot.slane %v721_v5, 1  ;;  %v935_v13 = vrot.slane %v721_v5, 2  ;;  %v3662_v63 = vld [vmem:[#allocation9 + $0xb8] sm:$0xff] }
 0x131   : > { %v565_v4 = vadd.f32 %v4377_v7, %v564_v1  ;;  %1790 = vmatmul.bf16.gmra.mxu3 %v4469_v0  ;;  %2750 = vmatpush.bf16.msra.mxu0 %v4501_v60  ;;  %v837_v1 = vrot.slane %v4391_v27, 1  ;;  %v4556_v27 = vld [vmem:[#allocation9 + $0x1d0] sm:$0xff] }
 0x132   : > { %v1008_v26 = vunpack.c.l.b16 %v806_v10  ;;  %2107 = vmatpush.bf16.msrb.mxu3 %v3662_v63  ;;  %v3691_v63 = vld [vmem:[#allocation9 + $0x1a0] sm:$0xff] }
 0x133   : > { %v591_v8 = vmax.f32 %v565_v4, 0.0  ;;  %1839 = vmatmul.bf16.gmra.mxu1 %v4474_v6  ;;  %v840_v4 = vrot.slane %v4498_v57, 1 }
 0x135   : > { %v682_v11 = vrot.slane %v591_v8, 7 }
 0x137   : > { %v683_v15 = vsel %vm641_vm1, %v681_v61, %v682_v11  ;;  %v729_v16 = vsel %vm641_vm1, %v682_v11, 0.0  ;;  %v4511_v11 = vld [vmem:[#allocation9 + $0x1f0] sm:$0xff] }
 0x138   : > { %v863_v17 = vrot.slane %v683_v15, 1  ;;  %v865_v18 = vrot.slane %v729_v16, 1  ;;  %v936_v19 = vrot.slane %v683_v15, 2  ;;  %v938_v21 = vrot.slane %v729_v16, 2  ;;  %v567_v22 = vpop.f32.mrf.mxu0  ;;  %2751 = vmatpush.bf16.msra.mxu0 %v4511_v11 }
 0x139   : > { %v568_v23 = vadd.f32 %v4377_v7, %v567_v22  ;;  %v807_v24 = vpack.c.bf16 %v683_v15, %v683_v15 }
 0x13a   : > { %v864_v28 = vsel %vm836_vm2, %v862_v12, %v863_v17  ;;  %v866_v30 = vsel %vm836_vm2, %v863_v17, %v865_v18  ;;  %v937_v32 = vsel %vm909_vm3, %v935_v13, %v936_v19  ;;  %v939_v33 = vsel %vm909_vm3, %v936_v19, %v938_v21  ;;  %v3661_v18 = vld [vmem:[#allocation9 + $0xb0] sm:$0xff] }
 0x13b   : > { %v592_v34 = vmax.f32 %v568_v23, 0.0  ;;  %v1009_v35 = vunpack.c.l.b16 %v807_v24  ;;  %v903_v36 = vpack.c.bf16 %v864_v28, %v864_v28  ;;  %v904_v38 = vpack.c.bf16 %v866_v30, %v866_v30  ;;  %v3693_v19 = vld [vmem:[#allocation9 + $0x1b0] sm:$0xff]  ;;  %2108 = vmatpush.bf16.msrb.mxu3 %v3661_v18 }
 0x13c   : > { %v976_v39 = vpack.c.bf16 %v937_v32, %v937_v32  ;;  %v977_v40 = vpack.c.bf16 %v939_v33, %v939_v33  ;;  %v913_v21 = vrot.slane %v4498_v57, 2  ;;  %2702 = vmatpush.bf16.msra.mxu1 %v3693_v19  ;;  %v4527_v57 = vld [vmem:[#allocation9 + $0x1e0] sm:$0xff] }
 0x13d   : > { %v4485_v41 = vpack.c.b16 %v1009_v35, %v1008_v26  ;;  %v1056_v42 = vunpack.c.l.b16 %v903_v36  ;;  %v1057_v44 = vunpack.c.l.b16 %v904_v38  ;;  %v684_v45 = vrot.slane %v592_v34, 7  ;;  %v4516_v26 = vld [vmem:[#allocation9 + $0x1e8] sm:$0xff] }
 0x13e   : > { %v1104_v47 = vunpack.c.l.b16 %v976_v39  ;;  %v1105_v48 = vunpack.c.l.b16 %v977_v40  ;;  %v3692_v34 = vld [vmem:[#allocation9 + $0x1a8] sm:$0xff]  ;;  %2752 = vmatpush.bf16.msra.mxu0 %v4516_v26 }
 0x13f   : > { %1746 = vmatmul.bf16.gmra.mxu2 %v4485_v41  ;;  %v4488_v51 = vpack.c.b16 %v1057_v44, %v1056_v42  ;;  %v722_v56 = vsel %vm641_vm1, 0.0, %v684_v45  ;;  %v3660_v40 = vld [vmem:[#allocation9 + $0xa8] sm:$0xff]  ;;  %v911_v42 = vrot.slane %v4406_v46, 2 }
 0x140   : > { %v569_v52 = vpop.f32.mrf.mxu0  ;;  %2037 = vmatmul.bf16.gmra.mxu0 %v4466_v58  ;;  %v4493_v50 = vpack.c.b16 %v1105_v48, %v1104_v47  ;;  %v808_v61 = vpack.c.bf16 %v722_v56, %v722_v56  ;;  %v867_v31 = vrot.slane %v722_v56, 1  ;;  %v940_v5 = vrot.slane %v722_v56, 2  ;;  %2703 = vmatpush.bf16.msra.mxu1 %v3692_v34 }
 0x141   : > { %v570_v55 = vadd.f32 %v4377_v7, %v569_v52  ;;  %1795 = vmatmul.bf16.gmra.mxu3 %v4488_v51  ;;  %v839_v47 = vsel %vm836_vm2, %v837_v1, %v838_v29 }
 0x142   : > { %v1010_v24 = vunpack.c.l.b16 %v808_v61  ;;  %v893_v61 = vpack.c.bf16 %v839_v47, %v839_v47  ;;  %2109 = vmatpush.bf16.msrb.mxu3 %v3660_v40  ;;  %2753 = vmatpush.bf16.msra.mxu0 %v4527_v57 }
 0x143   : > { %v593_v59 = vmax.f32 %v570_v55, 0.0  ;;  %1844 = vmatmul.bf16.gmra.mxu1 %v4493_v50 }
 0x144   : > { %2704 = vmatpush.bf16.msra.mxu1 %v3691_v63 }
 0x145   : > { %v685_v62 = vrot.slane %v593_v59, 7  ;;  %v841_v59 = vsel %vm836_vm2, %v838_v29, %v840_v4 }
 0x146   : > { %v894_v1 = vpack.c.bf16 %v841_v59, %v841_v59 }
 0x147   : > { %v686_v8 = vsel %vm641_vm1, %v684_v45, %v685_v62  ;;  %v730_v10 = vsel %vm641_vm1, %v685_v62, 0.0  ;;  %v3647_v62 = vld [vmem:[#allocation9 + $0x40] sm:$0xff] }
 0x148   : > { %v868_v12 = vrot.slane %v686_v8, 1  ;;  %v870_v13 = vrot.slane %v730_v10, 1  ;;  %v941_v15 = vrot.slane %v686_v8, 2  ;;  %v943_v16 = vrot.slane %v730_v10, 2  ;;  %v572_v17 = vpop.f32.mrf.mxu0  ;;  %2065 = vmatpush.bf16.msrb.mxu2 %v3647_v62  ;;  %v4570_v62 = vld [vmem:[#allocation9 + $0x1c8] sm:$0xff] }
 0x149   : > { %v573_v22 = vadd.f32 %v4377_v7, %v572_v17  ;;  %v809_v23 = vpack.c.bf16 %v686_v8, %v686_v8  ;;  %v4535_v10 = vunpack.c.l.b16 %v893_v61 }
 0x14a   : > { %v869_v28 = vsel %vm836_vm2, %v867_v31, %v868_v12  ;;  %v871_v30 = vsel %vm836_vm2, %v868_v12, %v870_v13  ;;  %v942_v32 = vsel %vm909_vm3, %v940_v5, %v941_v15  ;;  %v944_v33 = vsel %vm909_vm3, %v941_v15, %v943_v16  ;;  %v3659_v5 = vld [vmem:[#allocation9 + $0xa0] sm:$0xff]  ;;  %v4543_v13 = vld [vmem:[#allocation9 + $0x1d8] sm:$0xff] }
 0x14b   : > { %v594_v35 = vmax.f32 %v573_v22, 0.0  ;;  %v1011_v36 = vunpack.c.l.b16 %v809_v23  ;;  %v905_v38 = vpack.c.bf16 %v869_v28, %v869_v28  ;;  %v906_v39 = vpack.c.bf16 %v871_v30, %v871_v30  ;;  %2110 = vmatpush.bf16.msrb.mxu3 %v3659_v5  ;;  %v3658_v28 = vld [vmem:[#allocation9 + $0x98] sm:$0xff]  ;;  %2754 = vmatpush.bf16.msra.mxu0 %v4543_v13 }
 0x14c   : > { %v978_v44 = vpack.c.bf16 %v942_v32, %v942_v32  ;;  %v979_v45 = vpack.c.bf16 %v944_v33, %v944_v33  ;;  %v4537_v12 = vunpack.c.l.b16 %v894_v1  ;;  %v912_v15 = vsel %vm909_vm3, %v910_v2, %v911_v42  ;;  %v3690_v30 = vld [vmem:[#allocation9 + $0x198] sm:$0xff] }
 0x14d   : > { %v687_v48 = vrot.slane %v594_v35, 7  ;;  %v4524_v52 = vpack.c.b16 %v1011_v36, %v1010_v24  ;;  %v1058_v53 = vunpack.c.l.b16 %v905_v38  ;;  %v1059_v54 = vunpack.c.l.b16 %v906_v39  ;;  %2705 = vmatpush.bf16.msra.mxu1 %v3690_v30  ;;  %v3689_v36 = vld [vmem:[#allocation9 + $0x190] sm:$0xff] }
 0x14e   : > { %v1106_v55 = vunpack.c.l.b16 %v978_v44  ;;  %v1107_v56 = vunpack.c.l.b16 %v979_v45  ;;  %v914_v16 = vsel %vm909_vm3, %v911_v42, %v913_v21  ;;  %v1062_v18 = vpack.c.b16 %v4537_v12, %v4535_v10  ;;  %v3657_v45 = vld [vmem:[#allocation9 + $0x90] sm:$0xff] }
 0x14f   : > { %1751 = vmatmul.bf16.gmra.mxu2 %v4524_v52  ;;  %v4531_v46 = vpack.c.b16 %v1059_v54, %v1058_v53  ;;  %v723_v4 = vsel %vm641_vm1, 0.0, %v687_v48  ;;  %v966_v19 = vpack.c.bf16 %v912_v15, %v912_v15  ;;  %v967_v22 = vpack.c.bf16 %v914_v16, %v914_v16  ;;  %2111 = vmatpush.bf16.msrb.mxu3 %v3658_v28  ;;  %v3656_v16 = vld [vmem:[#allocation9 + $0x88] sm:$0xff]  ;;  %v4575_v28 = vld [vmem:[#allocation9 + $0x1c0] sm:$0xff] }
 0x150   : > { %v574_v31 = vpop.f32.mrf.mxu0  ;;  %2042 = vmatmul.bf16.gmra.mxu0 %v4485_v41  ;;  %v4540_v29 = vpack.c.b16 %v1107_v56, %v1106_v55  ;;  %v810_v23 = vpack.c.bf16 %v723_v4, %v723_v4  ;;  %v872_v21 = vrot.slane %v723_v4, 1  ;;  %v945_v33 = vrot.slane %v723_v4, 2 }
 0x151   : > { %v575_v8 = vadd.f32 %v4377_v7, %v574_v31  ;;  %1800 = vmatmul.bf16.gmra.mxu3 %v4531_v46  ;;  %v4552_v32 = vunpack.c.l.b16 %v966_v19  ;;  %v4558_v2 = vunpack.c.l.b16 %v967_v22  ;;  %2755 = vmatpush.bf16.msra.mxu0 %v4556_v27 }
 0x152   : > { %v1012_v54 = vunpack.c.l.b16 %v810_v23  ;;  %2706 = vmatpush.bf16.msra.mxu1 %v3689_v36  ;;  %v3687_v36 = vld [vmem:[#allocation9 + $0x180] sm:$0xff] }
 0x153   : > { %v595_v17 = vmax.f32 %v575_v8, 0.0  ;;  %1849 = vmatmul.bf16.gmra.mxu1 %v4540_v29  ;;  %v1110_v55 = vpack.c.b16 %v4558_v2, %v4552_v32  ;;  %v3688_v8 = vld [vmem:[#allocation9 + $0x188] sm:$0xff]  ;;  %2112 = vmatpush.bf16.msrb.mxu3 %v3657_v45 }
 0x155   : > { %v688_v24 = vrot.slane %v595_v17, 7  ;;  %2756 = vmatpush.bf16.msra.mxu0 %v4570_v62 }
 0x156   : > { %2707 = vmatpush.bf16.msra.mxu1 %v3688_v8 }
 0x157   : > { %v689_v34 = vsel %vm641_vm1, %v687_v48, %v688_v24  ;;  %v731_v35 = vsel %vm641_vm1, %v688_v24, 0.0  ;;  %2113 = vmatpush.bf16.msrb.mxu3 %v3656_v16 }
 0x158   : > { %v873_v38 = vrot.slane %v689_v34, 1  ;;  %v875_v39 = vrot.slane %v731_v35, 1  ;;  %v946_v40 = vrot.slane %v689_v34, 2  ;;  %v948_v42 = vrot.slane %v731_v35, 2  ;;  %v577_v44 = vpop.f32.mrf.mxu0  ;;  %v3655_v35 = vld [vmem:[#allocation9 + $0x80] sm:$0xff] }
 0x159   : > { %v578_v47 = vadd.f32 %v4377_v7, %v577_v44  ;;  %v811_v53 = vpack.c.bf16 %v689_v34, %v689_v34  ;;  %2757 = vmatpush.bf16.msra.mxu0 %v4575_v28 }
 0x15a   : > { %v874_v48 = vsel %vm836_vm2, %v872_v21, %v873_v38  ;;  %v876_v56 = vsel %vm836_vm2, %v873_v38, %v875_v39  ;;  %v947_v59 = vsel %vm909_vm3, %v945_v33, %v946_v40  ;;  %v949_v61 = vsel %vm909_vm3, %v946_v40, %v948_v42  ;;  %2708 = vmatpush.bf16.msra.mxu1 %v3687_v36  ;;  %v3710_v42 = vld [vmem:[#allocation9 + $0x238] sm:$0xff] }
 0x15b   : > { %v596_v63 = vmax.f32 %v578_v47, 0.0  ;;  %v1013_v1 = vunpack.c.l.b16 %v811_v53  ;;  %v907_v31 = vpack.c.bf16 %v874_v48, %v874_v48  ;;  %v908_v5 = vpack.c.bf16 %v876_v56, %v876_v56  ;;  %2114 = vmatpush.bf16.msrb.mxu3 %v3655_v35  ;;  %3727 = vmatpush.bf16.msra.mxu2 %v3710_v42  ;;  %v4599_v35 = vpop.f32.mrf.mxu1 }
 0x15c   : > { %v980_v4 = vpack.c.bf16 %v947_v59, %v947_v59  ;;  %v981_v15 = vpack.c.bf16 %v949_v61, %v949_v61 }
 0x15d   : > { %v4572_v17 = vpack.c.b16 %v1013_v1, %v1012_v54  ;;  %v1060_v19 = vunpack.c.l.b16 %v907_v31  ;;  %v1061_v22 = vunpack.c.l.b16 %v908_v5  ;;  %v690_v30 = vrot.slane %v596_v63, 7 }
 0x15e   : > { %v1108_v23 = vunpack.c.l.b16 %v980_v4  ;;  %v1109_v24 = vunpack.c.l.b16 %v981_v15  ;;  %3719 = vmatpush.bf16.msrb.mxu1 %v4501_v60 }
 0x15f   : > { %1756 = vmatmul.bf16.gmra.mxu2 %v4572_v17  ;;  %v4578_v21 = vpack.c.b16 %v1061_v22, %v1060_v19  ;;  %v724_v39 = vsel %vm641_vm1, 0.0, %v690_v30 }
 0x160   : > { %v579_v33 = vpop.f32.mrf.mxu0  ;;  %2047 = vmatmul.bf16.gmra.mxu0 %v4524_v52  ;;  %v4582_v38 = vpack.c.b16 %v1109_v24, %v1108_v23  ;;  %v1212_v45 = vpack.c.bf16 %v724_v39, %v724_v39  ;;  %v1273_v47 = vrot.slane %v724_v39, 1  ;;  %v1345_v63 = vrot.slane %v724_v39, 2 }
 0x161   : > { %v580_v34 = vadd.f32 %v4377_v7, %v579_v33  ;;  %1805 = vmatmul.bf16.gmra.mxu3 %v4578_v21 }
 0x162   : > { %3720 = vmatpush.bf16.msrb.mxu1 %v4511_v11  ;;  %v1412_v31 = vunpack.c.l.b16 %v1212_v45 }
 0x163   : > { %v597_v40 = vmax.f32 %v580_v34, 0.0  ;;  %1854 = vmatmul.bf16.gmra.mxu1 %v4582_v38 }
 0x165   : > { %v691_v44 = vrot.slane %v597_v40, 7  ;;  %v3709_v40 = vld [vmem:[#allocation9 + $0x230] sm:$0xff] }
 0x166   : > { %3721 = vmatpush.bf16.msrb.mxu1 %v4516_v26  ;;  %3728 = vmatpush.bf16.msra.mxu2 %v3709_v40  ;;  %v620_v26 = vpop.f32.mrf.mxu1 }
 0x167   : > { %v732_v53 = vsel %vm641_vm1, %v691_v44, 0.0  ;;  %v692_v54 = vsel %vm641_vm1, %v690_v30, %v691_v44 }
 0x168   : > { %v1276_v48 = vrot.slane %v732_v53, 1  ;;  %v1348_v56 = vrot.slane %v732_v53, 2  ;;  %v1213_v59 = vpack.c.bf16 %v692_v54, %v692_v54  ;;  %v1274_v61 = vrot.slane %v692_v54, 1 }
 0x169   : > { %v1346_v1 = vrot.slane %v692_v54, 2 }
 0x16a   : > { %v1413_v60 = vunpack.c.l.b16 %v1213_v59  ;;  %v1275_v5 = vsel %vm836_vm2, %v1273_v47, %v1274_v61  ;;  %v1277_v8 = vsel %vm836_vm2, %v1274_v61, %v1276_v48  ;;  %3722 = vmatpush.bf16.msrb.mxu1 %v4527_v57 }
 0x16b   : > { %v1308_v4 = vpack.c.bf16 %v1275_v5, %v1275_v5  ;;  %v1309_v15 = vpack.c.bf16 %v1277_v8, %v1277_v8  ;;  %v1347_v16 = vsel %vm909_vm3, %v1345_v63, %v1346_v1  ;;  %v1349_v19 = vsel %vm909_vm3, %v1346_v1, %v1348_v56 }
 0x16c   : > { %v4596_v22 = vpack.c.b16 %v1413_v60, %v1412_v31  ;;  %v1380_v23 = vpack.c.bf16 %v1347_v16, %v1347_v16  ;;  %v1381_v24 = vpack.c.bf16 %v1349_v19, %v1349_v19  ;;  %v3706_v19 = vld [vmem:[#allocation9 + $0x218] sm:$0xff] }
 0x16d   : > { %v1460_v11 = vunpack.c.l.b16 %v1308_v4  ;;  %v1461_v30 = vunpack.c.l.b16 %v1309_v15  ;;  %v621_v4 = vadd.f32 %v4377_v7, %v620_v26 }
 0x16e   : > { %v1508_v33 = vunpack.c.l.b16 %v1380_v23  ;;  %v1509_v34 = vunpack.c.l.b16 %v1381_v24  ;;  %3723 = vmatpush.bf16.msrb.mxu1 %v4543_v13  ;;  %v3708_v13 = vld [vmem:[#allocation9 + $0x228] sm:$0xff]  ;;  %v635_v24 = vstv %s634_s26  ;;  %s4032_s26 = scalar_lea.hbm %s4031_s2, 128 }
 0x16f   : > { %1761 = vmatmul.bf16.gmra.mxu2 %v4596_v22  ;;  %v4602_v36 = vpack.c.b16 %v1461_v30, %v1460_v11  ;;  %v626_v11 = vmax.f32 %v621_v4, 0.0  ;;  %vm636_vm4 = vcmp.eq.s32.totalorder %v635_v24, 1  ;;  %p4033_p8 = scmp.ne.s32.totalorder %s4031_s2, %s4032_s26 }
 0x170   : > { %2052 = vmatmul.bf16.gmra.mxu0 %v4572_v17  ;;  %v4606_v39 = vpack.c.b16 %v1509_v34, %v1508_v33  ;;  %3729 = vmatpush.bf16.msra.mxu2 %v3708_v13 }
 0x171   : > { %1810 = vmatmul.bf16.gmra.mxu3 %v4602_v36  ;;  %p4034_p10 = pnand %p4033_p8, %p4282_p3 }
 0x172   : > { %3724 = vmatpush.bf16.msrb.mxu1 %v4556_v27 }
 0x173   : > { %1859 = vmatmul.bf16.gmra.mxu1 %v4606_v39  ;;  %p4035_p11 = pneg %p4034_p10 }
 0x176   : > { %3725 = vmatpush.bf16.msrb.mxu1 %v4570_v62 }
 0x17a   : > { %3726 = vmatpush.bf16.msrb.mxu1 %v4575_v28 }
 0x17d   : > { %v2018_v44 = vpop.f32.mrf.mxu0 }
 0x17f   : > { %2066 = vmatmul.bf16.vlgmr.msrb.gmra.mxu2 %v1062_v18 }
 0x180   : > { %2758 = vmatmul.bf16.vlgmr.msra.gmra.mxu0 %v4432_v43  ;;  %v1825_v45 = vpop.f32.mrf.mxu1 }
 0x181   : > { %v1727_v57 = vpop.f32.mrf.mxu2  ;;  %2115 = vmatmul.bf16.vlgmr.msrb.gmra.mxu3 %v1110_v55  ;;  %v3707_v55 = vld [vmem:[#allocation9 + $0x220] sm:$0xff] }
 0x182   : > { %3730 = vmatpush.bf16.msra.mxu2 %v3707_v55 }
 0x183   : > { %2709 = vmatmul.bf16.vlgmr.msra.gmra.mxu1 %v4429_v37 }
 0x184   : > { %v1776_v27 = vpop.f32.mrf.mxu3  ;;  %2799 = vmatpush.bf16.msra.mxu1 %v3710_v42 }
 0x185   : > { %v2020_v62 = vpop.f32.mrf.mxu0  ;;  %v1777_v47 = vadd.f32 %v1776_v27, %v1727_v57 }
 0x186   : > { %3731 = vmatpush.bf16.msra.mxu2 %v3706_v19 }
 0x187   : > { %v1826_v10 = vadd.f32 %v1825_v45, %v1777_v47 }
 0x188   : > { %v1827_v18 = vpop.f32.mrf.mxu1  ;;  %2800 = vmatpush.bf16.msra.mxu1 %v3709_v40  ;;  %v638_v40 = vsel %vm636_vm4, 0.0, %v626_v11 }
 0x189   : > { %v1729_v12 = vpop.f32.mrf.mxu2  ;;  %v4622_v28 = vadd.f32 %v2018_v44, %v1826_v10 }
 0x18c   : > { %v1778_v53 = vpop.f32.mrf.mxu3  ;;  %2801 = vmatpush.bf16.msra.mxu1 %v3708_v13  ;;  %v761_v13 = vrot.slane %v638_v40, 7 }
 0x18d   : > { %v2023_v54 = vpop.f32.mrf.mxu0  ;;  %v1779_v48 = vadd.f32 %v1778_v53, %v1729_v12 }
 0x18e   : > { %v4649_v10 = vsel %vm641_vm1, %v761_v13, 0.0 }
 0x18f   : > { %2071 = vmatmul.bf16.gmra.mxu2 %v4415_v3  ;;  %v1828_v32 = vadd.f32 %v1827_v18, %v1779_v48 }
 0x190   : > { %2763 = vmatmul.bf16.gmra.mxu0 %v4450_v20  ;;  %v1830_v2 = vpop.f32.mrf.mxu1  ;;  %2802 = vmatpush.bf16.msra.mxu1 %v3707_v55 }
 0x191   : > { %2120 = vmatmul.bf16.gmra.mxu3 %v4419_v9  ;;  %v4627_v42 = vadd.f32 %v2020_v62, %v1828_v32 }
 0x192   : > { %v1732_v37 = vpop.f32.mrf.mxu2 }
 0x193   : > { %2714 = vmatmul.bf16.gmra.mxu1 %v4447_v14  ;;  %v619_v14 = vadd.f32 %v4377_v7, %v4599_v35 }
 0x194   : > { %v1781_v56 = vpop.f32.mrf.mxu3  ;;  %2803 = vmatpush.bf16.msra.mxu1 %v3706_v19 }
 0x195   : > { %v2025_v59 = vpop.f32.mrf.mxu0  ;;  %v1782_v61 = vadd.f32 %v1781_v56, %v1732_v37 }
 0x197   : > { %v1831_v3 = vadd.f32 %v1830_v2, %v1782_v61 }
 0x198   : > { %v1832_v1 = vpop.f32.mrf.mxu1 }
 0x199   : > { %v4630_v31 = vadd.f32 %v2023_v54, %v1831_v3  ;;  %v3705_v54 = vld [vmem:[#allocation9 + $0x210] sm:$0xff] }
 0x19a   : > { %v1734_v63 = vpop.f32.mrf.mxu2  ;;  %3732 = vmatpush.bf16.msra.mxu2 %v3705_v54  ;;  %2804 = vmatpush.bf16.msra.mxu1 %v3705_v54 }
 0x19c   : > { %v1783_v60 = vpop.f32.mrf.mxu3 }
 0x19d   : > { %v2028_v5 = vpop.f32.mrf.mxu0  ;;  %v1784_v8 = vadd.f32 %v1783_v60, %v1734_v63 }
 0x19f   : > { %2076 = vmatmul.bf16.gmra.mxu2 %v4432_v43  ;;  %v1833_v9 = vadd.f32 %v1832_v1, %v1784_v8  ;;  %v625_v43 = vmax.f32 %v619_v14, 0.0 }
 0x1a0   : > { %2768 = vmatmul.bf16.gmra.mxu0 %v4469_v0  ;;  %v1835_v16 = vpop.f32.mrf.mxu1 }
 0x1a1   : > { %2125 = vmatmul.bf16.gmra.mxu3 %v4436_v49  ;;  %v4639_v23 = vadd.f32 %v2025_v59, %v1833_v9  ;;  %v637_v7 = vsel %vm636_vm4, 0.0, %v625_v43 }
 0x1a2   : > { %v1737_v15 = vpop.f32.mrf.mxu2  ;;  %v760_v45 = vrot.slane %v637_v7, 7 }
 0x1a3   : > { %2719 = vmatmul.bf16.gmra.mxu1 %v4466_v58 }
 0x1a4   : > { %v1786_v30 = vpop.f32.mrf.mxu3  ;;  %v4646_v58 = vsel %vm641_vm1, 0.0, %v760_v45  ;;  %v4658_v37 = vsel %vm641_vm1, %v760_v45, %v761_v13 }
 0x1a5   : > { %v2030_v33 = vpop.f32.mrf.mxu0  ;;  %v1787_v34 = vadd.f32 %v1786_v30, %v1737_v15  ;;  %v2328_v32 = vrot.slane %v4646_v58, 2  ;;  %v2329_v2 = vrot.slane %v4658_v37, 2  ;;  %v3704_v30 = vld [vmem:[#allocation9 + $0x208] sm:$0xff] }
 0x1a6   : > { %3733 = vmatpush.bf16.msra.mxu2 %v3704_v30  ;;  %2805 = vmatpush.bf16.msra.mxu1 %v3704_v30 }
 0x1a7   : > { %v1836_v35 = vadd.f32 %v1835_v16, %v1787_v34  ;;  %v2330_v61 = vsel %vm909_vm3, %v2328_v32, %v2329_v2 }
 0x1a8   : > { %v1837_v44 = vpop.f32.mrf.mxu1  ;;  %v2363_v1 = vpack.c.bf16 %v2330_v61, %v2330_v61 }
 0x1a9   : > { %v4642_v57 = vadd.f32 %v2028_v5, %v1836_v35 }
 0x1aa   : > { %v1739_v26 = vpop.f32.mrf.mxu2  ;;  %v4666_v14 = vunpack.c.l.b16 %v2363_v1 }
 0x1ac   : > { %v1788_v27 = vpop.f32.mrf.mxu3 }
 0x1ad   : > { %v2033_v62 = vpop.f32.mrf.mxu0  ;;  %v1789_v47 = vadd.f32 %v1788_v27, %v1739_v26 }
 0x1af   : > { %2081 = vmatmul.bf16.gmra.mxu2 %v4450_v20  ;;  %v1838_v12 = vadd.f32 %v1837_v44, %v1789_v47  ;;  %v2331_v20 = vrot.slane %v4649_v10, 2 }
 0x1b0   : > { %2773 = vmatmul.bf16.gmra.mxu0 %v4488_v51  ;;  %v1840_v53 = vpop.f32.mrf.mxu1 }
 0x1b1   : > { %2130 = vmatmul.bf16.gmra.mxu3 %v4455_v25  ;;  %v4653_v48 = vadd.f32 %v2030_v33, %v1838_v12  ;;  %v2332_v3 = vsel %vm909_vm3, %v2329_v2, %v2331_v20 }
 0x1b2   : > { %v1742_v18 = vpop.f32.mrf.mxu2  ;;  %v2364_v5 = vpack.c.bf16 %v2332_v3, %v2332_v3 }
 0x1b3   : > { %2724 = vmatmul.bf16.gmra.mxu1 %v4485_v41 }
 0x1b4   : > { %v1791_v55 = vpop.f32.mrf.mxu3  ;;  %v4668_v4 = vunpack.c.l.b16 %v2364_v5 }
 0x1b5   : > { %v2035_v56 = vpop.f32.mrf.mxu0  ;;  %v1792_v59 = vadd.f32 %v1791_v55, %v1742_v18 }
 0x1b6   : > { %v2500_v16 = vpack.c.b16 %v4668_v4, %v4666_v14 }
 0x1b7   : > { %v1841_v63 = vadd.f32 %v1840_v53, %v1792_v59 }
 0x1b8   : > { %v1842_v8 = vpop.f32.mrf.mxu1 }
 0x1b9   : > { %v4664_v9 = vadd.f32 %v2033_v62, %v1841_v63 }
 0x1ba   : > { %v1744_v60 = vpop.f32.mrf.mxu2 }
 0x1bc   : > { %v1793_v15 = vpop.f32.mrf.mxu3 }
 0x1bd   : > { %v2038_v41 = vpop.f32.mrf.mxu0  ;;  %v1794_v19 = vadd.f32 %v1793_v15, %v1744_v60 }
 0x1bf   : > { %2086 = vmatmul.bf16.gmra.mxu2 %v4469_v0  ;;  %v1843_v24 = vadd.f32 %v1842_v8, %v1794_v19 }
 0x1c0   : > { %2778 = vmatmul.bf16.gmra.mxu0 %v4531_v46  ;;  %v1845_v11 = vpop.f32.mrf.mxu1 }
 0x1c1   : > { %2135 = vmatmul.bf16.gmra.mxu3 %v4474_v6  ;;  %v4675_v33 = vadd.f32 %v2035_v56, %v1843_v24 }
 0x1c2   : > { %v1747_v43 = vpop.f32.mrf.mxu2 }
 0x1c3   : > { %2729 = vmatmul.bf16.gmra.mxu1 %v4524_v52  ;;  %v3703_v52 = vld [vmem:[#allocation9 + $0x200] sm:$0xff] }
 0x1c4   : > { %v1796_v34 = vpop.f32.mrf.mxu3  ;;  %3734 = vmatpush.bf16.msra.mxu2 %v3703_v52  ;;  %2806 = vmatpush.bf16.msra.mxu1 %v3703_v52 }
 0x1c5   : > { %v2040_v35 = vpop.f32.mrf.mxu0  ;;  %v1797_v7 = vadd.f32 %v1796_v34, %v1747_v43 }
 0x1c7   : > { %v1846_v40 = vadd.f32 %v1845_v11, %v1797_v7 }
 0x1c8   : > { %v1847_v0 = vpop.f32.mrf.mxu1 }
 0x1c9   : > { %v4678_v44 = vadd.f32 %v2038_v41, %v1846_v40 }
 0x1ca   : > { %v1749_v26 = vpop.f32.mrf.mxu2 }
 0x1cc   : > { %v1798_v45 = vpop.f32.mrf.mxu3 }
 0x1cd   : > { %v1799_v13 = vadd.f32 %v1798_v45, %v1749_v26  ;;  %v2043_v27 = vpop.f32.mrf.mxu0  ;;  %v2259_v45 = vrot.slane %v4649_v10, 1 }
 0x1cf   : > { %2091 = vmatmul.bf16.gmra.mxu2 %v4488_v51  ;;  %v1848_v62 = vadd.f32 %v1847_v0, %v1799_v13  ;;  %v2256_v0 = vrot.slane %v4646_v58, 1  ;;  %v2257_v13 = vrot.slane %v4658_v37, 1 }
 0x1d0   : > { %2783 = vmatmul.bf16.gmra.mxu0 %v4578_v21  ;;  %v1850_v12 = vpop.f32.mrf.mxu1 }
 0x1d1   : > { %2140 = vmatmul.bf16.gmra.mxu3 %v4493_v50  ;;  %v4683_v18 = vadd.f32 %v2040_v35, %v1848_v62  ;;  %v2258_v52 = vsel %vm836_vm2, %v2256_v0, %v2257_v13 }
 0x1d2   : > { %v1752_v47 = vpop.f32.mrf.mxu2 }
 0x1d3   : > { %2734 = vmatmul.bf16.gmra.mxu1 %v4572_v17 }
 0x1d4   : > { %v1801_v53 = vpop.f32.mrf.mxu3 }
 0x1d5   : > { %v1802_v54 = vadd.f32 %v1801_v53, %v1752_v47  ;;  %v2045_v20 = vpop.f32.mrf.mxu0  ;;  %v2260_v53 = vsel %vm836_vm2, %v2257_v13, %v2259_v45 }
 0x1d7   : > { %v1851_v32 = vadd.f32 %v1850_v12, %v1802_v54 }
 0x1d8   : > { %v1852_v2 = vpop.f32.mrf.mxu1 }
 0x1d9   : > { %v4686_v55 = vadd.f32 %v2043_v27, %v1851_v32 }
 0x1da   : > { %v1754_v51 = vpop.f32.mrf.mxu2 }
 0x1dc   : > { %v1803_v56 = vpop.f32.mrf.mxu3 }
 0x1dd   : > { %v1804_v59 = vadd.f32 %v1803_v56, %v1754_v51  ;;  %v2048_v1 = vpop.f32.mrf.mxu0  ;;  %v2292_v51 = vpack.c.bf16 %v2260_v53, %v2260_v53 }
 0x1df   : > { %2096 = vmatmul.bf16.gmra.mxu2 %v4531_v46  ;;  %v1853_v61 = vadd.f32 %v1852_v2, %v1804_v59  ;;  %v2195_v46 = vpack.c.bf16 %v4646_v58, %v4646_v58  ;;  %v2291_v58 = vpack.c.bf16 %v2258_v52, %v2258_v52  ;;  %v2444_v56 = vunpack.c.l.b16 %v2292_v51  ;;  %v3712_v52 = vld [vmem:[#allocation11 + $0x8] sm:$0xff] }
 0x1e0   : > { %2788 = vmatmul.bf16.gmra.mxu0 %v4602_v36  ;;  %v1855_v63 = vpop.f32.mrf.mxu1  ;;  %v2196_v36 = vpack.c.bf16 %v4658_v37, %v4658_v37 }
 0x1e1   : > { %2145 = vmatmul.bf16.gmra.mxu3 %v4540_v29  ;;  %v4691_v17 = vadd.f32 %v2045_v20, %v1853_v61  ;;  %v2395_v30 = vunpack.c.l.b16 %v2195_v46  ;;  %v2443_v37 = vunpack.c.l.b16 %v2291_v58 }
 0x1e2   : > { %v1757_v3 = vpop.f32.mrf.mxu2 }
 0x1e3   : > { %2739 = vmatmul.bf16.gmra.mxu1 %v4596_v22  ;;  %v2396_v22 = vunpack.c.l.b16 %v2196_v36 }
 0x1e4   : > { %v1806_v60 = vpop.f32.mrf.mxu3 }
 0x1e5   : > { %v1807_v5 = vadd.f32 %v1806_v60, %v1757_v3  ;;  %v2050_v24 = vpop.f32.mrf.mxu0  ;;  %v2404_v26 = vpack.c.b16 %v2396_v22, %v2395_v30 }
 0x1e7   : > { %v1856_v8 = vadd.f32 %v1855_v63, %v1807_v5  ;;  %v2452_v5 = vpack.c.b16 %v2444_v56, %v2443_v37 }
 0x1e8   : > { %v1857_v41 = vpop.f32.mrf.mxu1 }
 0x1e9   : > { %v4694_v19 = vadd.f32 %v2048_v1, %v1856_v8  ;;  %v3717_v8 = vld [vmem:[#allocation11 + $0x30] sm:$0xff] }
 0x1ea   : > { %v1759_v15 = vpop.f32.mrf.mxu2 }
 0x1ec   : > { %v1808_v43 = vpop.f32.mrf.mxu3 }
 0x1ed   : > { %v1809_v11 = vadd.f32 %v1808_v43, %v1759_v15  ;;  %v2053_v47 = vpop.f32.mrf.mxu0 }
 0x1ef   : > { %2101 = vmatmul.bf16.gmra.mxu2 %v4578_v21  ;;  %v1858_v34 = vadd.f32 %v1857_v41, %v1809_v11  ;;  %v3718_v21 = vld [vmem:[#allocation11 + $0x38] sm:$0xff] }
 0x1f0   : > { %v1860_v7 = vpop.f32.mrf.mxu1  ;;  %3735 = vmatpush.bf16.msra.mxu3 %v3718_v21 }
 0x1f1   : > { %2150 = vmatmul.bf16.gmra.mxu3 %v4582_v38  ;;  %v4702_v40 = vadd.f32 %v2050_v24, %v1858_v34  ;;  %v3716_v24 = vld [vmem:[#allocation11 + $0x28] sm:$0xff] }
 0x1f2   : > { %v1762_v35 = vpop.f32.mrf.mxu2 }
 0x1f3   : > { %2744 = vmatmul.bf16.gmra.mxu1 %v2404_v26  ;;  %v3714_v26 = vld [vmem:[#allocation11 + $0x18] sm:$0xff] }
 0x1f4   : > { %v1811_v27 = vpop.f32.mrf.mxu3  ;;  %3736 = vmatpush.bf16.msra.mxu3 %v3717_v8 }
 0x1f5   : > { %v1812_v62 = vadd.f32 %v1811_v27, %v1762_v35  ;;  %v2055_v61 = vpop.f32.mrf.mxu0  ;;  %v3713_v27 = vld [vmem:[#allocation11 + $0x10] sm:$0xff] }
 0x1f7   : > { %v1861_v12 = vadd.f32 %v1860_v7, %v1812_v62 }
 0x1f8   : > { %v1862_v32 = vpop.f32.mrf.mxu1  ;;  %3737 = vmatpush.bf16.msra.mxu3 %v3716_v24 }
 0x1f9   : > { %v4709_v20 = vadd.f32 %v2053_v47, %v1861_v12 }
 0x1fa   : > { %v1764_v54 = vpop.f32.mrf.mxu2 }
 0x1fc   : > { %v1813_v10 = vpop.f32.mrf.mxu3 }
 0x1fd   : > { %v1814_v2 = vadd.f32 %v1813_v10, %v1764_v54 }
 0x1ff   : > { %2812 = vmatmul.bf16.vlgmr.msra.gmra.mxu2 %v4455_v25  ;;  %v1863_v59 = vadd.f32 %v1862_v32, %v1814_v2  ;;  %v3711_v2 = vld [vmem:[#allocation11] sm:$0xff] }
 0x200   : > { %v4712_v63 = vpop.f32.mrf.mxu1 }
 0x201   : > { %v4717_v60 = vadd.f32 %v2055_v61, %v1863_v59 }
 0x202   : > { %v2067_v3 = vpop.f32.mrf.mxu2 }
 0x203   : > { %v4715_v1 = vadd.f32 %v2067_v3, %v4622_v28  ;;  %2793 = vmatmul.bf16.vlgmr.msrb.gmra.mxu1 %v2452_v5 }
 0x204   : > { %2976 = vmatpush.bf16.msrb.mxu1 %v3718_v21 }
 0x208   : > { %v4719_v41 = vpop.f32.mrf.mxu1  ;;  %2977 = vmatpush.bf16.msrb.mxu1 %v3717_v8 }
 0x20a   : > { %v2069_v15 = vpop.f32.mrf.mxu2 }
 0x20b   : > { %v4722_v25 = vadd.f32 %v2069_v15, %v4627_v42 }
 0x20c   : > { %2978 = vmatpush.bf16.msrb.mxu1 %v3716_v24 }
 0x20f   : > { %2817 = vmatmul.bf16.gmra.mxu2 %v4474_v6 }
 0x210   : > { %v4725_v36 = vpop.f32.mrf.mxu1 }
 0x212   : > { %v2072_v46 = vpop.f32.mrf.mxu2 }
 0x213   : > { %v4728_v28 = vadd.f32 %v2072_v46, %v4630_v31  ;;  %2807 = vmatmul.bf16.vlgmr.msra.gmra.mxu1 %v4436_v49  ;;  %v3715_v31 = vld [vmem:[#allocation11 + $0x20] sm:$0xff] }
 0x214   : > { %3738 = vmatpush.bf16.msra.mxu3 %v3715_v31  ;;  %2979 = vmatpush.bf16.msrb.mxu1 %v3715_v31 }
 0x218   : > { %v4731_v11 = vpop.f32.mrf.mxu1  ;;  %3739 = vmatpush.bf16.msra.mxu3 %v3714_v26  ;;  %2980 = vmatpush.bf16.msrb.mxu1 %v3714_v26 }
 0x21a   : > { %v2074_v43 = vpop.f32.mrf.mxu2 }
 0x21b   : > { %v4734_v42 = vadd.f32 %v2074_v43, %v4639_v23 }
 0x21c   : > { %3740 = vmatpush.bf16.msra.mxu3 %v3713_v27  ;;  %2981 = vmatpush.bf16.msrb.mxu1 %v3713_v27 }
 0x21f   : > { %2822 = vmatmul.bf16.gmra.mxu2 %v4493_v50 }
 0x220   : > { %v4737_v30 = vpop.f32.mrf.mxu1  ;;  %3741 = vmatpush.bf16.msra.mxu3 %v3712_v52  ;;  %2982 = vmatpush.bf16.msrb.mxu1 %v3712_v52 }
 0x222   : > { %v2077_v6 = vpop.f32.mrf.mxu2 }
 0x223   : > { %v4740_v22 = vadd.f32 %v2077_v6, %v4642_v57 }
 0x224   : > { %3742 = vmatpush.bf16.msra.mxu3 %v3711_v2  ;;  %2983 = vmatpush.bf16.msrb.mxu1 %v3711_v2 }
 0x228   : > { %v4742_v34 = vpop.f32.mrf.mxu1 }
 0x22a   : > { %v2079_v49 = vpop.f32.mrf.mxu2 }
 0x22b   : > { %v4745_v35 = vadd.f32 %v2079_v49, %v4653_v48 }
 0x22f   : > { %2827 = vmatmul.bf16.gmra.mxu2 %v4540_v29 }
 0x230   : > { %v4748_v7 = vpop.f32.mrf.mxu1 }
 0x232   : > { %v2082_v23 = vpop.f32.mrf.mxu2 }
 0x233   : > { %v4751_v50 = vadd.f32 %v2082_v23, %v4664_v9 }
 0x238   : > { %v4753_v0 = vpop.f32.mrf.mxu1 }
 0x23a   : > { %v2084_v57 = vpop.f32.mrf.mxu2 }
 0x23b   : > { %v4756_v45 = vadd.f32 %v2084_v57, %v4675_v33  ;;  %v4770_v33 = vpop.f32.mrf.mxu3 }
 0x23f   : > { %2832 = vmatmul.bf16.gmra.mxu2 %v4582_v38 }
 0x240   : > { %v4759_v13 = vpop.f32.mrf.mxu1 }
 0x242   : > { %v2087_v48 = vpop.f32.mrf.mxu2 }
 0x243   : > { %v4762_v29 = vadd.f32 %v2087_v48, %v4678_v44  ;;  %v2759_v44 = vpop.f32.mrf.mxu0  ;;  %v4782_v32 = vpop.f32.mrf.mxu3 }
 0x248   : > { %v4764_v62 = vpop.f32.mrf.mxu1 }
 0x24a   : > { %v2089_v9 = vpop.f32.mrf.mxu2 }
 0x24b   : > { %v4767_v21 = vadd.f32 %v2089_v9, %v4683_v18  ;;  %v2121_v10 = vpop.f32.mrf.mxu3 }
 0x24c   : > { %v2122_v43 = vadd.f32 %v2121_v10, %v4728_v28 }
 0x24f   : > { %2837 = vmatmul.bf16.gmra.mxu2 %v4606_v39  ;;  %v2761_v39 = vpop.f32.mrf.mxu0 }
 0x250   : > { %v4772_v47 = vpop.f32.mrf.mxu1 }
 0x252   : > { %v2092_v38 = vpop.f32.mrf.mxu2 }
 0x253   : > { %v4775_v12 = vadd.f32 %v2092_v38, %v4686_v55  ;;  %v2123_v14 = vpop.f32.mrf.mxu3 }
 0x257   : > { %v2764_v37 = vpop.f32.mrf.mxu0 }
 0x258   : > { %v4777_v54 = vpop.f32.mrf.mxu1  ;;  %v2765_v24 = vadd.f32 %v2764_v37, %v4725_v36  ;;  %v2124_v36 = vadd.f32 %v2123_v14, %v4734_v42  ;;  %v2760_v37 = vadd.f32 %v2759_v44, %v4712_v63 }
 0x25a   : > { %v2094_v53 = vpop.f32.mrf.mxu2 }
 0x25b   : > { %v4780_v18 = vadd.f32 %v2094_v53, %v4691_v17 }
 0x25f   : > { %2842 = vmatmul.bf16.gmra.mxu2 %v2500_v16  ;;  %v2766_v3 = vpop.f32.mrf.mxu0 }
 0x260   : > { %v4787_v55 = vpop.f32.mrf.mxu1  ;;  %v2767_v57 = vadd.f32 %v2766_v3, %v4731_v11 }
 0x262   : > { %v2097_v58 = vpop.f32.mrf.mxu2 }
 0x263   : > { %v4790_v51 = vadd.f32 %v2097_v58, %v4694_v19  ;;  %v2126_v19 = vpop.f32.mrf.mxu3 }
 0x264   : > { %v2127_v42 = vadd.f32 %v2126_v19, %v4740_v22  ;;  %v2119_v19 = vadd.f32 %v4782_v32, %v4722_v25 }
 0x267   : > { %v2769_v46 = vpop.f32.mrf.mxu0 }
 0x268   : > { %v4792_v59 = vpop.f32.mrf.mxu1  ;;  %v2770_v11 = vadd.f32 %v2769_v46, %v4737_v30  ;;  %v2762_v46 = vadd.f32 %v2761_v39, %v4719_v41 }
 0x26a   : > { %v2099_v56 = vpop.f32.mrf.mxu2 }
 0x26b   : > { %v4795_v17 = vadd.f32 %v2099_v56, %v4702_v40  ;;  %v2128_v49 = vpop.f32.mrf.mxu3 }
 0x26c   : > { %v2129_v44 = vadd.f32 %v2128_v49, %v4745_v35 }
 0x26f   : > { %v2771_v26 = vpop.f32.mrf.mxu0 }
 0x270   : > { %v2745_v16 = vpop.f32.mrf.mxu1  ;;  %v2772_v30 = vadd.f32 %v2771_v26, %v4742_v34 }
 0x272   : > { %v2102_v4 = vpop.f32.mrf.mxu2 }
 0x273   : > { %v4798_v61 = vadd.f32 %v2102_v4, %v4709_v20  ;;  %v2131_v53 = vpop.f32.mrf.mxu3 }
 0x274   : > { %v2132_v32 = vadd.f32 %v2131_v53, %v4751_v50 }
 0x277   : > { %v2774_v56 = vpop.f32.mrf.mxu0 }
 0x278   : > { %v2747_v8 = vpop.f32.mrf.mxu1  ;;  %v2775_v39 = vadd.f32 %v2774_v56, %v4748_v7 }
 0x27a   : > { %v2104_v5 = vpop.f32.mrf.mxu2 }
 0x27b   : > { %v4801_v15 = vadd.f32 %v2104_v5, %v4717_v60  ;;  %v4811_v60 = vld [vmem:[%s5007_s16] ss:$0 sm:$0xff]  ;;  %v2117_v5 = vadd.f32 %v4770_v33, %v4715_v1 }
 0x280   : > { %v2794_v6 = vpop.f32.mrf.mxu1 }
 0x281   : > { %v4805_v23 = vadd.f32 %v2794_v6, %v2745_v16 }
 0x282   : > { %v2813_v40 = vpop.f32.mrf.mxu2 }
 0x283   : > { %v2814_v31 = vadd.f32 %v2813_v40, %v2765_v24 }
 0x285   : > { %v2850_v20 = vadd.f32 %v2814_v31, %v2122_v43  ;;  %v2133_v43 = vpop.f32.mrf.mxu3  ;;  %v2776_v31 = vpop.f32.mrf.mxu0 }
 0x286   : > { %v2134_v7 = vadd.f32 %v2133_v43, %v4756_v45 }
 0x287   : > { %v2870_v38 = vadd.f32 %v4811_v60, %v2850_v20 }
 0x288   : > { %v2796_v27 = vpop.f32.mrf.mxu1 }
 0x289   : > { %v4814_v28 = vadd.f32 %v2796_v27, %v2747_v8  ;;  %v2886_v10 = vmax.f32 %v2870_v38, 0.0 }
 0x28a   : > { %v2815_v48 = vpop.f32.mrf.mxu2 }
 0x28b   : > { %v2816_v9 = vadd.f32 %v2815_v48, %v2767_v57 }
 0x28d   : > { %v2851_v52 = vadd.f32 %v2816_v9, %v2124_v36  ;;  %v2136_v26 = vpop.f32.mrf.mxu3 }
 0x28f   : > { %v2871_v58 = vadd.f32 %v4811_v60, %v2851_v52 }
 0x290   : > { %v2808_v16 = vpop.f32.mrf.mxu1 }
 0x291   : > { %v2887_v2 = vmax.f32 %v2871_v58, 0.0  ;;  %v2809_v8 = vadd.f32 %v2808_v16, %v2760_v37 }
 0x292   : > { %v2818_v4 = vpop.f32.mrf.mxu2 }
 0x293   : > { %v2901_v14 = vpack.c.bf16 %v2887_v2, %v2886_v10  ;;  %v2819_v3 = vadd.f32 %v2818_v4, %v2770_v11  ;;  %v2848_v40 = vadd.f32 %v2809_v8, %v2117_v5  ;;  %v2779_v11 = vpop.f32.mrf.mxu0  ;;  %v2777_v10 = vadd.f32 %v2776_v31, %v4753_v0 }
 0x294   : > { %v2780_v53 = vadd.f32 %v2779_v11, %v4759_v13  ;;  %v2137_v8 = vadd.f32 %v2136_v26, %v4762_v29 }
 0x295   : > { %v2852_v24 = vadd.f32 %v2819_v3, %v2127_v42  ;;  %2989 = vmatmul.bf16.vlgmr.msra.gmra.mxu3 %v2901_v14  ;;  %v2868_v57 = vadd.f32 %v4811_v60, %v2848_v40  ;;  %v2138_v56 = vpop.f32.mrf.mxu3 }
 0x297   : > { %v2872_v1 = vadd.f32 %v4811_v60, %v2852_v24  ;;  %v2884_v36 = vmax.f32 %v2868_v57, 0.0 }
 0x298   : > { %v2810_v6 = vpop.f32.mrf.mxu1 }
 0x299   : > { %v2811_v20 = vadd.f32 %v2810_v6, %v2762_v46  ;;  %v2888_v35 = vmax.f32 %v2872_v1, 0.0 }
 0x29a   : > { %v2820_v63 = vpop.f32.mrf.mxu2 }
 0x29b   : > { %v2821_v22 = vadd.f32 %v2820_v63, %v2772_v30  ;;  %v2849_v48 = vadd.f32 %v2811_v20, %v2119_v19  ;;  %v2781_v50 = vpop.f32.mrf.mxu0  ;;  %v2139_v63 = vadd.f32 %v2138_v56, %v4767_v21 }
 0x29c   : > { %v2782_v43 = vadd.f32 %v2781_v50, %v4764_v62 }
 0x29d   : > { %v2853_v33 = vadd.f32 %v2821_v22, %v2129_v44  ;;  %v2869_v41 = vadd.f32 %v4811_v60, %v2849_v48  ;;  %v2141_v45 = vpop.f32.mrf.mxu3 }
 0x29f   : > { %v2873_v34 = vadd.f32 %v4811_v60, %v2853_v33  ;;  %v2885_v27 = vmax.f32 %v2869_v41, 0.0  ;;  %v2142_v33 = vadd.f32 %v2141_v45, %v4775_v12 }
 0x2a1   : > { %v2889_v49 = vmax.f32 %v2873_v34, 0.0  ;;  %v2900_v52 = vpack.c.bf16 %v2885_v27, %v2884_v36 }
 0x2a2   : > { %v2823_v25 = vpop.f32.mrf.mxu2 }
 0x2a3   : > { %v2824_v9 = vadd.f32 %v2823_v25, %v2775_v39  ;;  %v2902_v38 = vpack.c.bf16 %v2889_v49, %v2888_v35  ;;  %2984 = vmatmul.bf16.vlgmr.msrb.gmra.mxu1 %v2900_v52  ;;  %v2784_v30 = vpop.f32.mrf.mxu0 }
 0x2a4   : > { %v2785_v29 = vadd.f32 %v2784_v30, %v4772_v47  ;;  %v4865_v30 = vld [vmem:[%s5008_s14] ss:$0 sm:$0xff] }
 0x2a5   : > { %v2854_v58 = vadd.f32 %v2824_v9, %v2132_v32  ;;  %2994 = vmatmul.bf16.gmra.mxu3 %v2902_v38  ;;  %v2143_v19 = vpop.f32.mrf.mxu3 }
 0x2a6   : > { %v2144_v35 = vadd.f32 %v2143_v19, %v4780_v18  ;;  %v3025_v19 = vld [vmem:[%s4331_s5] sm:$0xff] }
 0x2a7   : > { %v2874_v4 = vadd.f32 %v4811_v60, %v2854_v58 }
 0x2a9   : > { %v2890_v16 = vmax.f32 %v2874_v4, 0.0 }
 0x2aa   : > { %v2825_v2 = vpop.f32.mrf.mxu2 }
 0x2ab   : > { %v2826_v37 = vadd.f32 %v2825_v2, %v2777_v10  ;;  %v2786_v48 = vpop.f32.mrf.mxu0 }
 0x2ac   : > { %v2787_v21 = vadd.f32 %v2786_v48, %v4777_v54 }
 0x2ad   : > { %v2855_v42 = vadd.f32 %v2826_v37, %v2134_v7  ;;  %v2146_v41 = vpop.f32.mrf.mxu3 }
 0x2ae   : > { %v2147_v38 = vadd.f32 %v2146_v41, %v4790_v51 }
 0x2af   : > { %v2875_v14 = vadd.f32 %v4811_v60, %v2855_v42 }
 0x2b1   : > { %v2891_v3 = vmax.f32 %v2875_v14, 0.0 }
 0x2b2   : > { %v2828_v5 = vpop.f32.mrf.mxu2 }
 0x2b3   : > { %v2829_v24 = vadd.f32 %v2828_v5, %v2780_v53  ;;  %v2903_v0 = vpack.c.bf16 %v2891_v3, %v2890_v16  ;;  %v2789_v36 = vpop.f32.mrf.mxu0 }
 0x2b4   : > { %v2790_v12 = vadd.f32 %v2789_v36, %v4787_v55  ;;  %v3030_v36 = vld [vmem:[%s4331_s5 + $0x28] sm:$0xff] }
 0x2b5   : > { %v2856_v40 = vadd.f32 %v2829_v24, %v2137_v8  ;;  %2999 = vmatmul.bf16.gmra.mxu3 %v2903_v0  ;;  %v2148_v58 = vpop.f32.mrf.mxu3 }
 0x2b6   : > { %v2149_v7 = vadd.f32 %v2148_v58, %v4795_v17 }
 0x2b7   : > { %v2876_v6 = vadd.f32 %v4811_v60, %v2856_v40 }
 0x2b9   : > { %v2892_v31 = vmax.f32 %v2876_v6, 0.0  ;;  %v3028_v6 = vld [vmem:[%s4331_s5 + $0x18] sm:$0xff] }
 0x2ba   : > { %v2830_v46 = vpop.f32.mrf.mxu2 }
 0x2bb   : > { %v2831_v44 = vadd.f32 %v2830_v46, %v2782_v43  ;;  %v2791_v18 = vpop.f32.mrf.mxu0 }
 0x2bc   : > { %v2792_v10 = vadd.f32 %v2791_v18, %v4792_v59 }
 0x2bd   : > { %v2857_v13 = vadd.f32 %v2831_v44, %v2139_v63  ;;  %v2151_v4 = vpop.f32.mrf.mxu3 }
 0x2be   : > { %v2152_v53 = vadd.f32 %v2151_v4, %v4798_v61 }
 0x2bf   : > { %v2877_v22 = vadd.f32 %v4811_v60, %v2857_v13 }
 0x2c1   : > { %v2893_v20 = vmax.f32 %v2877_v22, 0.0 }
 0x2c2   : > { %v2833_v1 = vpop.f32.mrf.mxu2 }
 0x2c3   : > { %v2834_v57 = vadd.f32 %v2833_v1, %v2785_v29  ;;  %v2904_v62 = vpack.c.bf16 %v2893_v20, %v2892_v31 }
 0x2c5   : > { %v2858_v34 = vadd.f32 %v2834_v57, %v2142_v33  ;;  %3004 = vmatmul.bf16.gmra.mxu3 %v2904_v62  ;;  %v2153_v5 = vpop.f32.mrf.mxu3  ;;  %v3029_v62 = vld [vmem:[%s4331_s5 + $0x20] sm:$0xff] }
 0x2c6   : > { %v2154_v8 = vadd.f32 %v2153_v5, %v4801_v15  ;;  %v3027_v15 = vld [vmem:[%s4331_s5 + $0x10] sm:$0xff] }
 0x2c7   : > { %v2878_v26 = vadd.f32 %v4811_v60, %v2858_v34 }
 0x2c9   : > { %v2894_v25 = vmax.f32 %v2878_v26, 0.0 }
 0x2ca   : > { %v2835_v39 = vpop.f32.mrf.mxu2 }
 0x2cb   : > { %v2836_v49 = vadd.f32 %v2835_v39, %v2787_v21  ;;  %v3026_v21 = vld [vmem:[%s4331_s5 + $0x8] sm:$0xff] }
 0x2cd   : > { %v2859_v47 = vadd.f32 %v2836_v49, %v2144_v35 }
 0x2cf   : > { %v2879_v27 = vadd.f32 %v4811_v60, %v2859_v47 }
 0x2d1   : > { %v2895_v32 = vmax.f32 %v2879_v27, 0.0 }
 0x2d2   : > { %v2838_v9 = vpop.f32.mrf.mxu2 }
 0x2d3   : > { %v2839_v52 = vadd.f32 %v2838_v9, %v2790_v12  ;;  %v2905_v54 = vpack.c.bf16 %v2895_v32, %v2894_v25  ;;  %v3031_v9 = vld [vmem:[%s4331_s5 + $0x30] sm:$0xff] }
 0x2d5   : > { %v2860_v11 = vadd.f32 %v2839_v52, %v2147_v38  ;;  %3009 = vmatmul.bf16.gmra.mxu3 %v2905_v54 }
 0x2d7   : > { %v2880_v56 = vadd.f32 %v4811_v60, %v2860_v11  ;;  %v3032_v11 = vld [vmem:[%s4331_s5 + $0x38] sm:$0xff] }
 0x2d9   : > { %v2896_v14 = vmax.f32 %v2880_v56, 0.0 }
 0x2da   : > { %v2840_v2 = vpop.f32.mrf.mxu2 }
 0x2db   : > { %v2841_v37 = vadd.f32 %v2840_v2, %v2792_v10 }
 0x2dd   : > { %v2861_v55 = vadd.f32 %v2841_v37, %v2149_v7  ;;  %v3033_v37 = vld [vmem:[%s4331_s5 + $0x40] sm:$0xff] }
 0x2df   : > { %v2881_v42 = vadd.f32 %v4811_v60, %v2861_v55 }
 0x2e1   : > { %v2897_v51 = vmax.f32 %v2881_v42, 0.0 }
 0x2e2   : > { %v2843_v50 = vpop.f32.mrf.mxu2 }
 0x2e3   : > { %v2844_v16 = vadd.f32 %v2843_v50, %v4805_v23  ;;  %v2906_v3 = vpack.c.bf16 %v2897_v51, %v2896_v14  ;;  %v3034_v14 = vld [vmem:[%s4331_s5 + $0x48] sm:$0xff] }
 0x2e5   : > { %v2862_v59 = vadd.f32 %v2844_v16, %v2152_v53  ;;  %3014 = vmatmul.bf16.gmra.mxu3 %v2906_v3  ;;  %v3035_v3 = vld [vmem:[%s4331_s5 + $0x50] sm:$0xff] }
 0x2e7   : > { %v2882_v0 = vadd.f32 %v4811_v60, %v2862_v59 }
 0x2e9   : > { %v2898_v61 = vmax.f32 %v2882_v0, 0.0 }
 0x2ea   : > { %v2845_v17 = vpop.f32.mrf.mxu2 }
 0x2eb   : > { %v2846_v24 = vadd.f32 %v2845_v17, %v4814_v28 }
 0x2ed   : > { %v2863_v40 = vadd.f32 %v2846_v24, %v2154_v8  ;;  %v3036_v24 = vld [vmem:[%s4331_s5 + $0x58] sm:$0xff] }
 0x2ef   : > { %v2883_v45 = vadd.f32 %v4811_v60, %v2863_v40 }
 0x2f1   : > { %v2899_v23 = vmax.f32 %v2883_v45, 0.0 }
 0x2f3   : > { %v2907_v43 = vpack.c.bf16 %v2899_v23, %v2898_v61  ;;  %v3037_v23 = vld [vmem:[%s4331_s5 + $0x60] sm:$0xff] }
 0x2f5   : > { %3019 = vmatmul.bf16.gmra.mxu3 %v2907_v43 }
 0x318   : > { %v2990_v46 = vpop.f32.mrf.mxu3 }
 0x319   : > { %v2991_v28 = vadd.f32 %v4865_v30, %v2990_v46 }
 0x31b   : > { %v3043_v63 = vadd.f32 %v3027_v15, %v2991_v28 }
 0x31d   : > { %v3059_v44 = vmax.f32 %v3043_v63, 0.0  ;;  %v3038_v63 = vld [vmem:[%s4331_s5 + $0x68] sm:$0xff] }
 0x31f   : > { %3075 = vst [vmem:[%s4871_s24 + $0x10] sm:$0xff] %v3059_v44 }
 0x320   : > { %v2992_v60 = vpop.f32.mrf.mxu3  ;;  %v2985_v22 = vpop.f32.mrf.mxu1 }
 0x321   : > { %v2993_v13 = vadd.f32 %v4865_v30, %v2992_v60  ;;  %v2986_v31 = vadd.f32 %v4865_v30, %v2985_v22  ;;  %v3039_v22 = vld [vmem:[%s4331_s5 + $0x70] sm:$0xff] }
 0x323   : > { %v3044_v29 = vadd.f32 %v3028_v6, %v2993_v13  ;;  %v3041_v1 = vadd.f32 %v3025_v19, %v2986_v31 }
 0x325   : > { %v3060_v20 = vmax.f32 %v3044_v29, 0.0  ;;  %v3057_v33 = vmax.f32 %v3041_v1, 0.0  ;;  %v3040_v1 = vld [vmem:[%s4331_s5 + $0x78] sm:$0xff]  ;;  %s4036_s5 = scalar_lea.hbm %s5010_s8, 512 }
 0x326   : > { %p4038_p13 = scmp.lt.s32.totalorder %s4036_s5, %s4032_s26 }
 0x327   : > { %3076 = vst [vmem:[%s4871_s24 + $0x18] sm:$0xff] %v3060_v20 }
 0x328   : > { %v2995_v57 = vpop.f32.mrf.mxu3  ;;  %3073 = vst [vmem:[%s4871_s24] sm:$0xff] %v3057_v33  ;;  %v2987_v34 = vpop.f32.mrf.mxu1  ;;  %p4039_p0 = por %p4038_p13, %p4037_p12 }
 0x329   : > { %v2996_v48 = vadd.f32 %v4865_v30, %v2995_v57  ;;  %v2988_v39 = vadd.f32 %v4865_v30, %v2987_v34 }
 0x32a   : > { %p4040_p5 = pnand %p4039_p0, %p4035_p11 }
 0x32b   : > { %v3045_v41 = vadd.f32 %v3029_v62, %v2996_v48  ;;  %v3042_v49 = vadd.f32 %v3026_v21, %v2988_v39 }
 0x32d   : > { %v3061_v35 = vmax.f32 %v3045_v41, 0.0  ;;  %v3058_v26 = vmax.f32 %v3042_v49, 0.0 }
 0x32f   : > { %3077 = vst [vmem:[%s4871_s24 + $0x20] sm:$0xff] %v3061_v35 }
 0x330   : > { %v2997_v47 = vpop.f32.mrf.mxu3  ;;  %3074 = vst [vmem:[%s4871_s24 + $0x8] sm:$0xff] %v3058_v26 }
 0x331   : > { %v2998_v27 = vadd.f32 %v4865_v30, %v2997_v47 }
 0x333   : > { %v3046_v12 = vadd.f32 %v3030_v36, %v2998_v27 }
 0x335   : > { %v3062_v25 = vmax.f32 %v3046_v12, 0.0 }
 0x337   : > { %3078 = vst [vmem:[%s4871_s24 + $0x28] sm:$0xff] %v3062_v25 }
 0x338   : > { %v3000_v32 = vpop.f32.mrf.mxu3 }
 0x339   : > { %v3001_v38 = vadd.f32 %v4865_v30, %v3000_v32 }
 0x33b   : > { %v3047_v52 = vadd.f32 %v3031_v9, %v3001_v38 }
 0x33d   : > { %v3063_v54 = vmax.f32 %v3047_v52, 0.0 }
 0x33f   : > { %3079 = vst [vmem:[%s4871_s24 + $0x30] sm:$0xff] %v3063_v54 }
 0x340   : > { %v3002_v58 = vpop.f32.mrf.mxu3 }
 0x341   : > { %v3003_v18 = vadd.f32 %v4865_v30, %v3002_v58 }
 0x343   : > { %v3048_v10 = vadd.f32 %v3032_v11, %v3003_v18 }
 0x345   : > { %v3064_v2 = vmax.f32 %v3048_v10, 0.0 }
 0x347   : > { %3080 = vst [vmem:[%s4871_s24 + $0x38] sm:$0xff] %v3064_v2 }
 0x348   : > { %v3005_v7 = vpop.f32.mrf.mxu3 }
 0x349   : > { %v3006_v56 = vadd.f32 %v4865_v30, %v3005_v7 }
 0x34b   : > { %v3049_v55 = vadd.f32 %v3033_v37, %v3006_v56 }
 0x34d   : > { %v3065_v4 = vmax.f32 %v3049_v55, 0.0 }
 0x34f   : > { %3081 = vst [vmem:[%s4871_s24 + $0x40] sm:$0xff] %v3065_v4 }
 0x350   : > { %v3007_v42 = vpop.f32.mrf.mxu3 }
 0x351   : > { %v3008_v51 = vadd.f32 %v4865_v30, %v3007_v42 }
 0x353   : > { %v3050_v50 = vadd.f32 %v3034_v14, %v3008_v51 }
 0x355   : > { %v3066_v53 = vmax.f32 %v3050_v50, 0.0 }
 0x357   : > { %3082 = vst [vmem:[%s4871_s24 + $0x48] sm:$0xff] %v3066_v53 }
 0x358   : > { %v3010_v16 = vpop.f32.mrf.mxu3 }
 0x359   : > { %v3011_v59 = vadd.f32 %v4865_v30, %v3010_v16 }
 0x35b   : > { %v3051_v5 = vadd.f32 %v3035_v3, %v3011_v59 }
 0x35d   : > { %v3067_v17 = vmax.f32 %v3051_v5, 0.0 }
 0x35f   : > { %3083 = vst [vmem:[%s4871_s24 + $0x50] sm:$0xff] %v3067_v17 }
 0x360   : > { %v3012_v8 = vpop.f32.mrf.mxu3 }
 0x361   : > { %v3013_v0 = vadd.f32 %v4865_v30, %v3012_v8 }
 0x363   : > { %v3052_v40 = vadd.f32 %v3036_v24, %v3013_v0 }
 0x365   : > { %v3068_v45 = vmax.f32 %v3052_v40, 0.0 }
 0x367   : > { %3084 = vst [vmem:[%s4871_s24 + $0x58] sm:$0xff] %v3068_v45 }
 0x368   : > { %v3015_v61 = vpop.f32.mrf.mxu3 }
 0x369   : > { %v3016_v43 = vadd.f32 %v4865_v30, %v3015_v61 }
 0x36b   : > { %v3053_v46 = vadd.f32 %v3037_v23, %v3016_v43 }
 0x36d   : > { %v3069_v15 = vmax.f32 %v3053_v46, 0.0 }
 0x36f   : > { %3085 = vst [vmem:[%s4871_s24 + $0x60] sm:$0xff] %v3069_v15 }
 0x370   : > { %v3017_v28 = vpop.f32.mrf.mxu3 }
 0x371   : > { %v3018_v44 = vadd.f32 %v4865_v30, %v3017_v28 }
 0x373   : > { %v3054_v60 = vadd.f32 %v3038_v63, %v3018_v44 }
 0x375   : > { %v3070_v6 = vmax.f32 %v3054_v60, 0.0 }
 0x377   : > { %3086 = vst [vmem:[%s4871_s24 + $0x68] sm:$0xff] %v3070_v6 }
 0x378   : > { %v3020_v13 = vpop.f32.mrf.mxu3 }
 0x379   : > { %v3021_v19 = vadd.f32 %v4865_v30, %v3020_v13 }
 0x37b   : > { %v3055_v29 = vadd.f32 %v3039_v22, %v3021_v19 }
 0x37d   : > { %v3071_v31 = vmax.f32 %v3055_v29, 0.0 }
 0x37f   : > { %3087 = vst [vmem:[%s4871_s24 + $0x70] sm:$0xff] %v3071_v31 }
 0x380   : > { %v3022_v20 = vpop.f32.mrf.mxu3 }
 0x381   : > { %v3023_v33 = vadd.f32 %v4865_v30, %v3022_v20 }
 0x383   : > { %v3056_v57 = vadd.f32 %v3040_v1, %v3023_v33 }
 0x385   : > { %v3072_v62 = vmax.f32 %v3056_v57, 0.0 }
 0x387   : > { %3088 = vst [vmem:[%s4871_s24 + $0x78] sm:$0xff] %v3072_v62 }
 0x388   : > { %4043 = shalt.err (!%p4040_p5)
}
 0x389   : > { %s4135_s6 = smov 128   ;;  %s4136_s4 = smov 8  }
 0x38a   : > { %3759 = dma.vmem_to_hbm [thread:$0]  (%p4282_p3), %s3105_s30, 2048, %s3107_s13, %s3090_s15, %s4135_s6, %s4135_s6, %s4136_s4  }
 0x38b PF: > { %s5012_s14 = sld [smem:[#allocation18_spill]]  ;;  %p3789_p7 = scmp.ge.s32.totalorder %s4126_s12, 2 }
 0x38d   : > { %p3779_p9 = pnand %p3789_p7, %p4237_p6 }
 0x38f   : > { %p3780_p2 = pneg %p3779_p9 }
 0x391   : > { %s3121_s22 = sand.u32 1, %s5012_s14  }
 0x392   : > { %s3122_s23 = scalar_lea.sflag [#allocation5], %s3121_s22 }
 0x393   : > { %4093 = dma.done.wait (%p3780_p2), %s3122_s23, 2048  }
 0x394   : > { %4095 = vsyncadd (%p3780_p2), %s3122_s23, 4294965248  ;;  %s28_s12 = sadd.s32 1, %s4126_s12   ;;  %s5014_s17 = sld [smem:[#allocation19_spill]] }
 0x395   : > { %p25_p1 = scmp.ge.s32.totalorder %s28_s12, 6   ;;  %s5015_s29 = sld [smem:[#allocation25_spill]] }
 0x396   : > { %s5016_s18 = sld [smem:[#allocation22_spill]]  ;;  %s5018_s27 = smov %s4102_s28 }
 0x397   : > { %s5017_s19 = sld [smem:[#allocation24_spill]]  ;;  %s5020_s30 = smov %s4118_s10 }
 0x398   : > { %s5021_s9 = smov %s4122_s11 }
 0x399   :  { %27 = sbr.rel (!%p25_p1) target bundleno = 17 (0x11), region = 125 }
 0x39a   : > { %s5019_s28 = smov %s5014_s17 }
 0x39c   : > { %s5022_s10 = smov %s5016_s18 }
 0x39d   : > { %s5023_s11 = smov %s5017_s19 }
 0x39e   :  { %3128 = vsyncpa [#allocation4], 1 }
 0x39f   :  { %3130 = vsyncpa [#allocation4 + $0x1], 1 }
 0x3a0   :  { %3131 = vsyncpa [#allocation7], 1 }
 0x3a1   :  { %3133 = vsyncpa [#allocation7 + $0x1], 1 }
 0x3a2   :  { %3134 = vsyncpa [#allocation10], 1 }
 0x3a3   :  { %3135 = vsyncpa [#allocation5], 1 }
 0x3a4   :  { %3137 = vsyncpa [#allocation5 + $0x1], 1 }

</bundles_post_ra>
